<compile_context>
chip_gen: v6e
topology: v6e:2x2x1
jax: 0.10.0
libtpu: 0.0.40
codegen_flags: <defaults>
</compile_context>

<pallas_src>
import functools

import jax
import jax.numpy as jnp
from jax import lax
from jax.experimental import pallas as pl
from jax.experimental.pallas import tpu as pltpu


def _round_up(x, m):
    return (x + m - 1) // m * m


# ----------------------------------------------------------------------------
# Pallas kernel: whole bottleneck forward for NB batch elements per grid step.
# ----------------------------------------------------------------------------
def _bottleneck_kernel(x_ref, bn1s_ref, bn1b_ref, w1_ref, bn2s_ref, bn2b_ref,
                       w2_ref, bn3s_ref, bn3b_ref, w3_ref, *rest,
                       NB, H, W, Cp, Pp, Ep, stride, has_shortcut):
    if has_shortcut:
        wsc_ref, out_ref, pad_ref = rest
    else:
        wsc_ref = None
        out_ref, pad_ref = rest

    Ho = (H - 1) // stride + 1
    Wo = (W - 1) // stride + 1
    M = NB * H * W
    Mo = NB * Ho * Wo
    f32 = jnp.float32
    bf16 = jnp.bfloat16

    x = x_ref[...].reshape(M, Cp)                                   # f32

    # ---- BN1 + ReLU (pre-activation), f32 on the VPU -----------------------
    h1 = jnp.maximum(x * bn1s_ref[...] + bn1b_ref[...], 0.0)
    h1b = h1.astype(bf16)

    # ---- conv1: one block-diagonal 1x1 matmul on the MXU --------------------
    o1 = jnp.dot(h1b, w1_ref[...], preferred_element_type=f32)       # (M, Pp)

    # ---- BN2 + ReLU ---------------------------------------------------------
    h2b = jnp.maximum(o1 * bn2s_ref[...] + bn2b_ref[...], 0.0).astype(bf16)
    h2b = h2b.reshape(NB, H, W, Pp)

    # ---- conv2: 3x3 grouped conv as a single im2col matmul ------------------
    # Zero only the 1-pixel halo of the bf16 staging buffer each step; the
    # interior is fully overwritten, so no whole-buffer zero fill is needed.
    zr = jnp.zeros((NB, 1, W + 2, Pp), bf16)
    zc = jnp.zeros((NB, H, 1, Pp), bf16)
    pad_ref[:, 0:1, :, :] = zr
    pad_ref[:, H + 1:H + 2, :, :] = zr
    pad_ref[:, 1:H + 1, 0:1, :] = zc
    pad_ref[:, 1:H + 1, W + 1:W + 2, :] = zc
    pad_ref[:, 1:H + 1, 1:W + 1, :] = h2b
    padded = pad_ref[...]                                  # (NB, H+2, W+2, Pp)

    rows = stride * (Ho - 1) + 1
    cols = stride * (Wo - 1) + 1
    taps = []
    for ky in range(3):
        for kx in range(3):
            taps.append(padded[:, ky:ky + rows:stride,
                               kx:kx + cols:stride, :])     # (NB, Ho, Wo, Pp)
    patches = jnp.concatenate(taps, axis=-1).reshape(Mo, 9 * Pp)     # bf16
    o2 = jnp.dot(patches, w2_ref[...], preferred_element_type=f32)   # (Mo, Pp)

    # ---- BN3 + ReLU ---------------------------------------------------------
    h3b = jnp.maximum(o2 * bn3s_ref[...] + bn3b_ref[...], 0.0).astype(bf16)

    # ---- conv3: block-diagonal 1x1 matmul to expansion*planes ---------------
    o3 = jnp.dot(h3b, w3_ref[...], preferred_element_type=f32)       # (Mo, Ep)

    # ---- shortcut ------------------------------------------------------------
    if has_shortcut:
        if stride == 1:
            h1s = h1b
        else:
            h1s = h1b.reshape(NB, H, W, Cp)[:, ::stride, ::stride, :]
            h1s = h1s.reshape(Mo, Cp)
        sc = jnp.dot(h1s, wsc_ref[...], preferred_element_type=f32)  # (Mo, Ep)
    else:
        sc = x  # identity shortcut uses raw input (PyTorch semantics)

    out_ref[...] = (o3 + sc).reshape(NB, Ho, Wo, Ep)


# ----------------------------------------------------------------------------
# Weight / BN packing into MXU-friendly, 128-lane-padded form.
# ----------------------------------------------------------------------------
def _block_diag(w, rows_p, cols_p):
    # w: (groups, ci, co) per-group 1x1 conv weights -> (rows_p, cols_p) bf16.
    g, ci, co = w.shape
    bd = jnp.zeros((rows_p, cols_p), jnp.float32)
    for k in range(g):
        bd = bd.at[k * ci:(k + 1) * ci, k * co:(k + 1) * co].set(w[k])
    return bd.astype(jnp.bfloat16)


def _im2col_weight(w2, planes_p):
    # w2: (3, 3, groups, cpg, cpg) -> (9*planes_p, planes_p), tap-major rows.
    _, _, g, ci, co = w2.shape
    bd = jnp.zeros((9, planes_p, planes_p), jnp.float32)
    for ky in range(3):
        for kx in range(3):
            t = ky * 3 + kx
            for k in range(g):
                bd = bd.at[t, k * ci:(k + 1) * ci,
                           k * co:(k + 1) * co].set(w2[ky, kx, k])
    return bd.reshape(9 * planes_p, planes_p).astype(jnp.bfloat16)


def _pad_bn(v, c_pad):
    c = v.shape[0]
    return jnp.pad(v, (0, c_pad - c)).reshape(1, c_pad).astype(jnp.float32)


def _pick_batch_block(n, hw, target_rows=512):
    cap = max(1, target_rows // hw)
    nb = 1
    for d in range(1, n + 1):
        if n % d == 0 and d <= cap:
            nb = d
    return nb


# ----------------------------------------------------------------------------
# Wrapper: pack params, build grid / BlockSpecs, call pallas_call.
# ----------------------------------------------------------------------------
def preact_grouped_bottleneck(x_nhwc, params, *, planes, stride):
    bn1s, bn1b, wsc, w1, bn2s, bn2b, w2, bn3s, bn3b, w3 = params
    N, H, W, Cin = x_nhwc.shape
    groups = 3
    cout = 4 * planes
    Ho = (H - 1) // stride + 1
    Wo = (W - 1) // stride + 1
    has_shortcut = (stride != 1) or (Cin != cout)

    Cp = _round_up(Cin, 128)
    Pp = _round_up(planes, 128)
    Ep = _round_up(cout, 128)

    # Block-diagonal (grouped) weights, zero-padded to 128-lane channel dims.
    w1_bd = _block_diag(w1, Cp, Pp)
    w3_bd = _block_diag(w3, Pp, Ep)
    w2_bd = _im2col_weight(w2, Pp)
    wsc_bd = _block_diag(wsc, Cp, Ep) if has_shortcut else None

    bn1s_p, bn1b_p = _pad_bn(bn1s, Cp), _pad_bn(bn1b, Cp)
    bn2s_p, bn2b_p = _pad_bn(bn2s, Pp), _pad_bn(bn2b, Pp)
    bn3s_p, bn3b_p = _pad_bn(bn3s, Pp), _pad_bn(bn3b, Pp)

    x_p = jnp.pad(x_nhwc, ((0, 0), (0, 0), (0, 0), (0, Cp - Cin)))

    # Several batch elements per grid step so the MXU sees large M.
    NB = _pick_batch_block(N, H * W)
    grid = (N // NB,)

    kernel = functools.partial(
        _bottleneck_kernel, NB=NB, H=H, W=W, Cp=Cp, Pp=Pp, Ep=Ep,
        stride=stride, has_shortcut=has_shortcut)

    def fixed(shape):
        rank = len(shape)
        return pl.BlockSpec(shape, lambda n, _r=rank: (0,) * _r)

    in_specs = [
        pl.BlockSpec((NB, H, W, Cp), lambda n: (n, 0, 0, 0)),   # x
        fixed(bn1s_p.shape), fixed(bn1b_p.shape),
        fixed(w1_bd.shape),
        fixed(bn2s_p.shape), fixed(bn2b_p.shape),
        fixed(w2_bd.shape),
        fixed(bn3s_p.shape), fixed(bn3b_p.shape),
        fixed(w3_bd.shape),
    ]
    inputs = [x_p, bn1s_p, bn1b_p, w1_bd, bn2s_p, bn2b_p, w2_bd,
              bn3s_p, bn3b_p, w3_bd]
    if has_shortcut:
        in_specs.append(fixed(wsc_bd.shape))
        inputs.append(wsc_bd)

    out_specs = pl.BlockSpec((NB, Ho, Wo, Ep), lambda n: (n, 0, 0, 0))

    # Rough per-step working set (doubled for pipelining / compiler slack).
    bytes_per_step = (
        2 * NB * H * W * Cp * 4                       # input (double-buffered)
        + 2 * NB * Ho * Wo * Ep * 4                   # output
        + NB * (H + 2) * (W + 2) * Pp * 2             # conv2 staging (bf16)
        + 2 * 2 * (Cp * Pp + 9 * Pp * Pp + Pp * Ep + Cp * Ep)   # weights
        + NB * Ho * Wo * 9 * Pp * 2                   # im2col patch matrix
        + 6 * NB * H * W * max(Cp, Pp, Ep) * 4)       # f32 intermediates
    vmem_limit = int(min(64 * 1024 * 1024,
                         max(32 * 1024 * 1024, 2 * bytes_per_step)))

    grid_spec = pltpu.PrefetchScalarGridSpec(
        num_scalar_prefetch=0,
        grid=grid,
        in_specs=in_specs,
        out_specs=out_specs,
        scratch_shapes=[pltpu.VMEM((NB, H + 2, W + 2, Pp), jnp.bfloat16)],
    )

    out = pl.pallas_call(
        kernel,
        out_shape=jax.ShapeDtypeStruct((N, Ho, Wo, Ep), jnp.float32),
        grid_spec=grid_spec,
        compiler_params=pltpu.CompilerParams(
            dimension_semantics=("parallel",),
            vmem_limit_bytes=vmem_limit),
    )(*inputs)

    return out[..., :cout]


# ----------------------------------------------------------------------------
# Deterministic parameter construction (synthetic, not a checkpoint load).
# ----------------------------------------------------------------------------
def make_params(key, in_planes, planes):
    groups = 3
    cout = 4 * planes
    cig = in_planes // groups
    cpg = planes // groups
    cepg = cout // groups
    ks = jax.random.split(key, 16)

    def bn_fold(kg, kb, km, kv, c):
        gamma = jax.random.uniform(kg, (c,), jnp.float32, 0.8, 1.2)
        beta = 0.1 * jax.random.normal(kb, (c,), jnp.float32)
        mean = 0.1 * jax.random.normal(km, (c,), jnp.float32)
        var = jax.random.uniform(kv, (c,), jnp.float32, 0.5, 1.5)
        scale = gamma / jnp.sqrt(var + 1e-5)
        bias = beta - mean * scale
        return scale, bias

    bn1s, bn1b = bn_fold(ks[0], ks[1], ks[2], ks[3], in_planes)
    bn2s, bn2b = bn_fold(ks[4], ks[5], ks[6], ks[7], planes)
    bn3s, bn3b = bn_fold(ks[8], ks[9], ks[10], ks[11], planes)

    w1 = 0.2 * jax.random.normal(ks[12], (groups, cig, cpg), jnp.float32)
    w2 = 0.2 * jax.random.normal(ks[13], (3, 3, groups, cpg, cpg), jnp.float32)
    w3 = 0.2 * jax.random.normal(ks[14], (groups, cpg, cepg), jnp.float32)
    wsc = 0.2 * jax.random.normal(ks[15], (groups, cig, cepg), jnp.float32)
    return bn1s, bn1b, wsc, w1, bn2s, bn2b, w2, bn3s, bn3b, w3


# ----------------------------------------------------------------------------
# Pure-JAX reference (lax grouped convolutions, same bf16 matmul inputs).
# ----------------------------------------------------------------------------
def reference(x_nhwc, params, *, planes, stride):
    bn1s, bn1b, wsc, w1, bn2s, bn2b, w2, bn3s, bn3b, w3 = params
    groups = 3
    cout = 4 * planes
    dn = ('NHWC', 'HWIO', 'NHWC')
    bf16 = jnp.bfloat16

    def to_hwio_1x1(wg):  # (g, ci, co_pg) -> (1, 1, ci, g*co_pg)
        g, ci, co = wg.shape
        return wg.transpose(1, 0, 2).reshape(ci, g * co)[None, None]

    def to_hwio_3x3(wg):  # (3, 3, g, ci, co_pg) -> (3, 3, ci, g*co_pg)
        kh, kw, g, ci, co = wg.shape
        return wg.transpose(0, 1, 3, 2, 4).reshape(kh, kw, ci, g * co)

    def conv(x, w, s, padding):
        return lax.conv_general_dilated(
            x.astype(bf16), w.astype(bf16), (s, s), padding,
            dimension_numbers=dn, feature_group_count=groups,
            preferred_element_type=jnp.float32)

    def bnrelu(x, s, b):
        return jnp.maximum(x * s + b, 0.0)

    h1 = bnrelu(x_nhwc, bn1s, bn1b)
    if stride != 1 or x_nhwc.shape[-1] != cout:
        sc = conv(h1, to_hwio_1x1(wsc), stride, 'VALID')
    else:
        sc = x_nhwc
    o1 = conv(h1, to_hwio_1x1(w1), 1, 'VALID')
    h2 = bnrelu(o1, bn2s, bn2b)
    o2 = conv(h2, to_hwio_3x3(w2), stride, ((1, 1), (1, 1)))
    h3 = bnrelu(o2, bn3s, bn3b)
    o3 = conv(h3, to_hwio_1x1(w3), 1, 'VALID')
    return o3 + sc


if __name__ == "__main__":
    key = jax.random.PRNGKey(0)
    kx, kp = jax.random.split(key)

    # Small shapes: batch=2, in_planes=24, planes=24 (divisible by groups=3),
    # spatial 8x8, stride=1.  expansion*planes=96 != in_planes, so the grouped
    # 1x1 projection shortcut is exercised too.
    N, in_planes, H, W = 2, 24, 8, 8
    planes, stride = 24, 1

    x_nchw = jax.random.normal(kx, (N, in_planes, H, W), jnp.float32)  # torch layout
    x_nhwc = jnp.transpose(x_nchw, (0, 2, 3, 1))                       # kernel layout
    params = make_params(kp, in_planes, planes)

    out = preact_grouped_bottleneck(x_nhwc, params, planes=planes, stride=stride)
    out = jax.block_until_ready(out)

    ref = reference(x_nhwc, params, planes=planes, stride=stride)
    assert out.shape == ref.shape, (out.shape, ref.shape)
    max_err = jnp.max(jnp.abs(out - ref))
    # bf16 MXU inputs with f32 accumulation in both kernel and reference;
    # tolerance covers accumulation-order / bf16 re-rounding differences only.
    if not jnp.allclose(out, ref, atol=1e-2, rtol=1e-2):
        raise AssertionError(f"mismatch, max abs err = {max_err}")

    print("KERNEL_OK")
</pallas_src>

<mosaic_0001>
module attributes {stable_mosaic.version = 11 : i64} {
  func.func @_bottleneck_kernel(%arg0: i32, %arg1: memref<2x8x8x128xf32, #tpu.memory_space<vmem>>, %arg2: memref<1x128xf32, #tpu.memory_space<vmem>>, %arg3: memref<1x128xf32, #tpu.memory_space<vmem>>, %arg4: memref<128x128xbf16, #tpu.memory_space<vmem>>, %arg5: memref<1x128xf32, #tpu.memory_space<vmem>>, %arg6: memref<1x128xf32, #tpu.memory_space<vmem>>, %arg7: memref<1152x128xbf16, #tpu.memory_space<vmem>>, %arg8: memref<1x128xf32, #tpu.memory_space<vmem>>, %arg9: memref<1x128xf32, #tpu.memory_space<vmem>>, %arg10: memref<128x128xbf16, #tpu.memory_space<vmem>>, %arg11: memref<128x128xbf16, #tpu.memory_space<vmem>>, %arg12: memref<2x8x8x128xf32, #tpu.memory_space<vmem>>, %arg13: memref<2x10x10x128xbf16, #tpu.memory_space<vmem>>) attributes {dimension_semantics = [#tpu.dimension_semantics<parallel>], iteration_bounds = array<i64: 1>, scalar_prefetch = 0 : i64, scratch_operands = 1 : i64, tpu.core_type = #tpu.core_type<tc>, window_params = [{transform_indices = @transform_0, window_bounds = array<i64: 2, 8, 8, 128>}, {pipeline_mode = #tpu.pipeline_mode<synchronous>, transform_indices = @transform_1, window_bounds = array<i64: 1, 128>}, {pipeline_mode = #tpu.pipeline_mode<synchronous>, transform_indices = @transform_2, window_bounds = array<i64: 1, 128>}, {pipeline_mode = #tpu.pipeline_mode<synchronous>, transform_indices = @transform_3, window_bounds = array<i64: 128, 128>}, {pipeline_mode = #tpu.pipeline_mode<synchronous>, transform_indices = @transform_4, window_bounds = array<i64: 1, 128>}, {pipeline_mode = #tpu.pipeline_mode<synchronous>, transform_indices = @transform_5, window_bounds = array<i64: 1, 128>}, {pipeline_mode = #tpu.pipeline_mode<synchronous>, transform_indices = @transform_6, window_bounds = array<i64: 1152, 128>}, {pipeline_mode = #tpu.pipeline_mode<synchronous>, transform_indices = @transform_7, window_bounds = array<i64: 1, 128>}, {pipeline_mode = #tpu.pipeline_mode<synchronous>, transform_indices = @transform_8, window_bounds = array<i64: 1, 128>}, {pipeline_mode = #tpu.pipeline_mode<synchronous>, transform_indices = @transform_9, window_bounds = array<i64: 128, 128>}, {pipeline_mode = #tpu.pipeline_mode<synchronous>, transform_indices = @transform_10, window_bounds = array<i64: 128, 128>}, {transform_indices = @transform_11, window_bounds = array<i64: 2, 8, 8, 128>}]} {
    %c0 = arith.constant 0 : index
    %c0_0 = arith.constant 0 : index
    %c0_1 = arith.constant 0 : index
    %c0_2 = arith.constant 0 : index
    %0 = vector.load %arg1[%c0, %c0_0, %c0_1, %c0_2] : memref<2x8x8x128xf32, #tpu.memory_space<vmem>>, vector<2x8x8x128xf32>
    %1 = vector.shape_cast %0 : vector<2x8x8x128xf32> to vector<128x128xf32>
    %c0_3 = arith.constant 0 : index
    %c0_4 = arith.constant 0 : index
    %2 = vector.load %arg2[%c0_3, %c0_4] : memref<1x128xf32, #tpu.memory_space<vmem>>, vector<1x128xf32>
    %3 = vector.broadcast %2 : vector<1x128xf32> to vector<128x128xf32>
    %4 = arith.mulf %1, %3 : vector<128x128xf32>
    %c0_5 = arith.constant 0 : index
    %c0_6 = arith.constant 0 : index
    %5 = vector.load %arg3[%c0_5, %c0_6] : memref<1x128xf32, #tpu.memory_space<vmem>>, vector<1x128xf32>
    %6 = vector.broadcast %5 : vector<1x128xf32> to vector<128x128xf32>
    %7 = arith.addf %4, %6 : vector<128x128xf32>
    %cst = arith.constant 0.000000e+00 : f32
    %8 = vector.broadcast %cst : f32 to vector<128x128xf32>
    %9 = arith.maximumf %7, %8 : vector<128x128xf32>
    %10 = arith.truncf %9 : vector<128x128xf32> to vector<128x128xbf16>
    %c0_7 = arith.constant 0 : index
    %c0_8 = arith.constant 0 : index
    %11 = vector.load %arg4[%c0_7, %c0_8] : memref<128x128xbf16, #tpu.memory_space<vmem>>, vector<128x128xbf16>
    %cst_9 = arith.constant dense<0.000000e+00> : vector<128x128xf32>
    %12 = tpu.matmul %10, %11, %cst_9 {dimension_numbers = #tpu.dot_dimension_numbers<[1], [0], [0], [1], [0, 0, 1, 1], [], []>} : vector<128x128xbf16>, vector<128x128xbf16>, vector<128x128xf32> -> vector<128x128xf32>
    %c0_10 = arith.constant 0 : index
    %c0_11 = arith.constant 0 : index
    %13 = vector.load %arg5[%c0_10, %c0_11] : memref<1x128xf32, #tpu.memory_space<vmem>>, vector<1x128xf32>
    %14 = vector.broadcast %13 : vector<1x128xf32> to vector<128x128xf32>
    %15 = arith.mulf %12, %14 : vector<128x128xf32>
    %c0_12 = arith.constant 0 : index
    %c0_13 = arith.constant 0 : index
    %16 = vector.load %arg6[%c0_12, %c0_13] : memref<1x128xf32, #tpu.memory_space<vmem>>, vector<1x128xf32>
    %17 = vector.broadcast %16 : vector<1x128xf32> to vector<128x128xf32>
    %18 = arith.addf %15, %17 : vector<128x128xf32>
    %cst_14 = arith.constant 0.000000e+00 : f32
    %19 = vector.broadcast %cst_14 : f32 to vector<128x128xf32>
    %20 = arith.maximumf %18, %19 : vector<128x128xf32>
    %21 = arith.truncf %20 : vector<128x128xf32> to vector<128x128xbf16>
    %22 = vector.shape_cast %21 : vector<128x128xbf16> to vector<2x8x8x128xbf16>
    %cst_15 = arith.constant 0.000000e+00 : bf16
    %23 = vector.broadcast %cst_15 : bf16 to vector<2x1x10x128xbf16>
    %cst_16 = arith.constant 0.000000e+00 : bf16
    %24 = vector.broadcast %cst_16 : bf16 to vector<2x8x1x128xbf16>
    %c0_17 = arith.constant 0 : index
    %c0_18 = arith.constant 0 : index
    %c0_19 = arith.constant 0 : index
    %c0_20 = arith.constant 0 : index
    %25 = vector.load %arg13[%c0_17, %c0_18, %c0_19, %c0_20] : memref<2x10x10x128xbf16, #tpu.memory_space<vmem>>, vector<2x1x10x128xbf16>
    tpu.vector_store %arg13[%c0_17, %c0_18, %c0_19, %c0_20], %23 {strides = array<i32>} : memref<2x10x10x128xbf16, #tpu.memory_space<vmem>>, vector<2x1x10x128xbf16>,
    %c0_21 = arith.constant 0 : index
    %c9 = arith.constant 9 : index
    %c0_22 = arith.constant 0 : index
    %c0_23 = arith.constant 0 : index
    %26 = vector.load %arg13[%c0_21, %c9, %c0_22, %c0_23] : memref<2x10x10x128xbf16, #tpu.memory_space<vmem>>, vector<2x1x10x128xbf16>
    tpu.vector_store %arg13[%c0_21, %c9, %c0_22, %c0_23], %23 {strides = array<i32>} : memref<2x10x10x128xbf16, #tpu.memory_space<vmem>>, vector<2x1x10x128xbf16>,
    %c0_24 = arith.constant 0 : index
    %c1 = arith.constant 1 : index
    %c0_25 = arith.constant 0 : index
    %c0_26 = arith.constant 0 : index
    %27 = vector.load %arg13[%c0_24, %c1, %c0_25, %c0_26] : memref<2x10x10x128xbf16, #tpu.memory_space<vmem>>, vector<2x8x1x128xbf16>
    tpu.vector_store %arg13[%c0_24, %c1, %c0_25, %c0_26], %24 {strides = array<i32>} : memref<2x10x10x128xbf16, #tpu.memory_space<vmem>>, vector<2x8x1x128xbf16>,
    %c0_27 = arith.constant 0 : index
    %c1_28 = arith.constant 1 : index
    %c9_29 = arith.constant 9 : index
    %c0_30 = arith.constant 0 : index
    %28 = vector.load %arg13[%c0_27, %c1_28, %c9_29, %c0_30] : memref<2x10x10x128xbf16, #tpu.memory_space<vmem>>, vector<2x8x1x128xbf16>
    tpu.vector_store %arg13[%c0_27, %c1_28, %c9_29, %c0_30], %24 {strides = array<i32>} : memref<2x10x10x128xbf16, #tpu.memory_space<vmem>>, vector<2x8x1x128xbf16>,
    %c0_31 = arith.constant 0 : index
    %c1_32 = arith.constant 1 : index
    %c1_33 = arith.constant 1 : index
    %c0_34 = arith.constant 0 : index
    %29 = vector.load %arg13[%c0_31, %c1_32, %c1_33, %c0_34] : memref<2x10x10x128xbf16, #tpu.memory_space<vmem>>, vector<2x8x8x128xbf16>
    tpu.vector_store %arg13[%c0_31, %c1_32, %c1_33, %c0_34], %22 {strides = array<i32>} : memref<2x10x10x128xbf16, #tpu.memory_space<vmem>>, vector<2x8x8x128xbf16>,
    %c0_35 = arith.constant 0 : index
    %c0_36 = arith.constant 0 : index
    %c0_37 = arith.constant 0 : index
    %c0_38 = arith.constant 0 : index
    %30 = vector.load %arg13[%c0_35, %c0_36, %c0_37, %c0_38] : memref<2x10x10x128xbf16, #tpu.memory_space<vmem>>, vector<2x10x10x128xbf16>
    %31 = vector.extract_strided_slice %30 {offsets = [0, 0, 0, 0], sizes = [2, 8, 8, 128], strides = [1, 1, 1, 1]} : vector<2x10x10x128xbf16> to vector<2x8x8x128xbf16>
    %32 = vector.extract_strided_slice %30 {offsets = [0, 0, 1, 0], sizes = [2, 8, 8, 128], strides = [1, 1, 1, 1]} : vector<2x10x10x128xbf16> to vector<2x8x8x128xbf16>
    %33 = vector.extract_strided_slice %30 {offsets = [0, 0, 2, 0], sizes = [2, 8, 8, 128], strides = [1, 1, 1, 1]} : vector<2x10x10x128xbf16> to vector<2x8x8x128xbf16>
    %34 = vector.extract_strided_slice %30 {offsets = [0, 1, 0, 0], sizes = [2, 8, 8, 128], strides = [1, 1, 1, 1]} : vector<2x10x10x128xbf16> to vector<2x8x8x128xbf16>
    %35 = vector.extract_strided_slice %30 {offsets = [0, 1, 1, 0], sizes = [2, 8, 8, 128], strides = [1, 1, 1, 1]} : vector<2x10x10x128xbf16> to vector<2x8x8x128xbf16>
    %36 = vector.extract_strided_slice %30 {offsets = [0, 1, 2, 0], sizes = [2, 8, 8, 128], strides = [1, 1, 1, 1]} : vector<2x10x10x128xbf16> to vector<2x8x8x128xbf16>
    %37 = vector.extract_strided_slice %30 {offsets = [0, 2, 0, 0], sizes = [2, 8, 8, 128], strides = [1, 1, 1, 1]} : vector<2x10x10x128xbf16> to vector<2x8x8x128xbf16>
    %38 = vector.extract_strided_slice %30 {offsets = [0, 2, 1, 0], sizes = [2, 8, 8, 128], strides = [1, 1, 1, 1]} : vector<2x10x10x128xbf16> to vector<2x8x8x128xbf16>
    %39 = vector.extract_strided_slice %30 {offsets = [0, 2, 2, 0], sizes = [2, 8, 8, 128], strides = [1, 1, 1, 1]} : vector<2x10x10x128xbf16> to vector<2x8x8x128xbf16>
    %40 = tpu.concatenate %31, %32, %33, %34, %35, %36, %37, %38, %39 in 3 : vector<2x8x8x128xbf16>, vector<2x8x8x128xbf16>, vector<2x8x8x128xbf16>, vector<2x8x8x128xbf16>, vector<2x8x8x128xbf16>, vector<2x8x8x128xbf16>, vector<2x8x8x128xbf16>, vector<2x8x8x128xbf16>, vector<2x8x8x128xbf16> -> vector<2x8x8x1152xbf16>
    %41 = vector.shape_cast %40 : vector<2x8x8x1152xbf16> to vector<128x1152xbf16>
    %c0_39 = arith.constant 0 : index
    %c0_40 = arith.constant 0 : index
    %42 = vector.load %arg7[%c0_39, %c0_40] : memref<1152x128xbf16, #tpu.memory_space<vmem>>, vector<1152x128xbf16>
    %cst_41 = arith.constant dense<0.000000e+00> : vector<128x128xf32>
    %43 = tpu.matmul %41, %42, %cst_41 {dimension_numbers = #tpu.dot_dimension_numbers<[1], [0], [0], [1], [0, 0, 1, 1], [], []>} : vector<128x1152xbf16>, vector<1152x128xbf16>, vector<128x128xf32> -> vector<128x128xf32>
    %c0_42 = arith.constant 0 : index
    %c0_43 = arith.constant 0 : index
    %44 = vector.load %arg8[%c0_42, %c0_43] : memref<1x128xf32, #tpu.memory_space<vmem>>, vector<1x128xf32>
    %45 = vector.broadcast %44 : vector<1x128xf32> to vector<128x128xf32>
    %46 = arith.mulf %43, %45 : vector<128x128xf32>
    %c0_44 = arith.constant 0 : index
    %c0_45 = arith.constant 0 : index
    %47 = vector.load %arg9[%c0_44, %c0_45] : memref<1x128xf32, #tpu.memory_space<vmem>>, vector<1x128xf32>
    %48 = vector.broadcast %47 : vector<1x128xf32> to vector<128x128xf32>
    %49 = arith.addf %46, %48 : vector<128x128xf32>
    %cst_46 = arith.constant 0.000000e+00 : f32
    %50 = vector.broadcast %cst_46 : f32 to vector<128x128xf32>
    %51 = arith.maximumf %49, %50 : vector<128x128xf32>
    %52 = arith.truncf %51 : vector<128x128xf32> to vector<128x128xbf16>
    %c0_47 = arith.constant 0 : index
    %c0_48 = arith.constant 0 : index
    %53 = vector.load %arg10[%c0_47, %c0_48] : memref<128x128xbf16, #tpu.memory_space<vmem>>, vector<128x128xbf16>
    %cst_49 = arith.constant dense<0.000000e+00> : vector<128x128xf32>
    %54 = tpu.matmul %52, %53, %cst_49 {dimension_numbers = #tpu.dot_dimension_numbers<[1], [0], [0], [1], [0, 0, 1, 1], [], []>} : vector<128x128xbf16>, vector<128x128xbf16>, vector<128x128xf32> -> vector<128x128xf32>
    %c0_50 = arith.constant 0 : index
    %c0_51 = arith.constant 0 : index
    %55 = vector.load %arg11[%c0_50, %c0_51] : memref<128x128xbf16, #tpu.memory_space<vmem>>, vector<128x128xbf16>
    %cst_52 = arith.constant dense<0.000000e+00> : vector<128x128xf32>
    %56 = tpu.matmul %10, %55, %cst_52 {dimension_numbers = #tpu.dot_dimension_numbers<[1], [0], [0], [1], [0, 0, 1, 1], [], []>} : vector<128x128xbf16>, vector<128x128xbf16>, vector<128x128xf32> -> vector<128x128xf32>
    %57 = arith.addf %54, %56 : vector<128x128xf32>
    %58 = vector.shape_cast %57 : vector<128x128xf32> to vector<2x8x8x128xf32>
    %c0_53 = arith.constant 0 : index
    %c0_54 = arith.constant 0 : index
    %c0_55 = arith.constant 0 : index
    %c0_56 = arith.constant 0 : index
    %59 = vector.load %arg12[%c0_53, %c0_54, %c0_55, %c0_56] : memref<2x8x8x128xf32, #tpu.memory_space<vmem>>, vector<2x8x8x128xf32>
    tpu.vector_store %arg12[%c0_53, %c0_54, %c0_55, %c0_56], %58 {strides = array<i32>} : memref<2x8x8x128xf32, #tpu.memory_space<vmem>>, vector<2x8x8x128xf32>,
    return
  }
  func.func @transform_0(%arg0: i32) -> (i32, i32, i32, i32) {
    %c0_i32 = arith.constant 0 : i32
    %c0_i32_0 = arith.constant 0 : i32
    %c0_i32_1 = arith.constant 0 : i32
    %c0_i32_2 = arith.constant 0 : i32
    return %arg0, %c0_i32, %c0_i32_0, %c0_i32_1 : i32, i32, i32, i32
  }
  func.func @transform_1(%arg0: i32) -> (i32, i32) {
    %c0_i32 = arith.constant 0 : i32
    %c0_i32_0 = arith.constant 0 : i32
    %c0_i32_1 = arith.constant 0 : i32
    return %c0_i32, %c0_i32_0 : i32, i32
  }
  func.func @transform_2(%arg0: i32) -> (i32, i32) {
    %c0_i32 = arith.constant 0 : i32
    %c0_i32_0 = arith.constant 0 : i32
    %c0_i32_1 = arith.constant 0 : i32
    return %c0_i32, %c0_i32_0 : i32, i32
  }
  func.func @transform_3(%arg0: i32) -> (i32, i32) {
    %c0_i32 = arith.constant 0 : i32
    %c0_i32_0 = arith.constant 0 : i32
    %c0_i32_1 = arith.constant 0 : i32
    return %c0_i32, %c0_i32_0 : i32, i32
  }
  func.func @transform_4(%arg0: i32) -> (i32, i32) {
    %c0_i32 = arith.constant 0 : i32
    %c0_i32_0 = arith.constant 0 : i32
    %c0_i32_1 = arith.constant 0 : i32
    return %c0_i32, %c0_i32_0 : i32, i32
  }
  func.func @transform_5(%arg0: i32) -> (i32, i32) {
    %c0_i32 = arith.constant 0 : i32
    %c0_i32_0 = arith.constant 0 : i32
    %c0_i32_1 = arith.constant 0 : i32
    return %c0_i32, %c0_i32_0 : i32, i32
  }
  func.func @transform_6(%arg0: i32) -> (i32, i32) {
    %c0_i32 = arith.constant 0 : i32
    %c0_i32_0 = arith.constant 0 : i32
    %c0_i32_1 = arith.constant 0 : i32
    return %c0_i32, %c0_i32_0 : i32, i32
  }
  func.func @transform_7(%arg0: i32) -> (i32, i32) {
    %c0_i32 = arith.constant 0 : i32
    %c0_i32_0 = arith.constant 0 : i32
    %c0_i32_1 = arith.constant 0 : i32
    return %c0_i32, %c0_i32_0 : i32, i32
  }
  func.func @transform_8(%arg0: i32) -> (i32, i32) {
    %c0_i32 = arith.constant 0 : i32
    %c0_i32_0 = arith.constant 0 : i32
    %c0_i32_1 = arith.constant 0 : i32
    return %c0_i32, %c0_i32_0 : i32, i32
  }
  func.func @transform_9(%arg0: i32) -> (i32, i32) {
    %c0_i32 = arith.constant 0 : i32
    %c0_i32_0 = arith.constant 0 : i32
    %c0_i32_1 = arith.constant 0 : i32
    return %c0_i32, %c0_i32_0 : i32, i32
  }
  func.func @transform_10(%arg0: i32) -> (i32, i32) {
    %c0_i32 = arith.constant 0 : i32
    %c0_i32_0 = arith.constant 0 : i32
    %c0_i32_1 = arith.constant 0 : i32
    return %c0_i32, %c0_i32_0 : i32, i32
  }
  func.func @transform_11(%arg0: i32) -> (i32, i32, i32, i32) {
    %c0_i32 = arith.constant 0 : i32
    %c0_i32_0 = arith.constant 0 : i32
    %c0_i32_1 = arith.constant 0 : i32
    %c0_i32_2 = arith.constant 0 : i32
    return %arg0, %c0_i32, %c0_i32_0, %c0_i32_1 : i32, i32, i32, i32
  }
}

</mosaic_0001>

<bundles_post_ra>
// kernel: tpu_custom_call.1
= control target key start
LH: loop header
LB: loop body
LE: loop exit
PB: predicated region body
PF: predicated region fallthrough
CT: control target
= control target key end

     0   :  { %16 = vsyncpa [#allocation4], 0  ;;  %s4674_s0 = inlined_call_operand.hbm [shape: f32[2,8,8,128], index: 0, kind: input, shape index: {}]   ;;  %s4675_s1 = inlined_call_operand.vmem [shape: f32[1,128], index: 1, kind: input, shape index: {}]   ;;  %s4676_s2 = inlined_call_operand.vmem [shape: f32[1,128], index: 2, kind: input, shape index: {}]   ;;  %s4677_s3 = inlined_call_operand.hbm [shape: bf16[128,128], index: 3, kind: input, shape index: {}]   ;;  %s4678_s4 = inlined_call_operand.vmem [shape: f32[1,128], index: 4, kind: input, shape index: {}]   ;;  %s4679_s5 = inlined_call_operand.vmem [shape: f32[1,128], index: 5, kind: input, shape index: {}]   ;;  %s4680_s6 = inlined_call_operand.hbm [shape: bf16[1152,128], index: 6, kind: input, shape index: {}]   ;;  %s4681_s7 = inlined_call_operand.vmem [shape: f32[1,128], index: 7, kind: input, shape index: {}]   ;;  %s4682_s8 = inlined_call_operand.vmem [shape: f32[1,128], index: 8, kind: input, shape index: {}]   ;;  %s4683_s9 = inlined_call_operand.hbm [shape: bf16[128,128], index: 9, kind: input, shape index: {}]   ;;  %s4684_s10 = inlined_call_operand.hbm [shape: bf16[128,128], index: 10, kind: input, shape index: {}]   ;;  %s4685_s11 = inlined_call_operand.hbm [shape: f32[2,8,8,128], index: 11, kind: output, shape index: {}]  }
   0x1   :  { %17 = vsyncpa [#allocation7], 0 }
   0x2   :  { %18 = vsyncpa [#allocation10], 0 }
   0x3   :  { %19 = vsyncpa [#allocation5], 0  ;;  %s3698_s17 = smov [#allocation6]  }
   0x4   :  { %s41_s18 = sshll.u32 %s3698_s17, 4  ;;  %s42_s18 = int_to_ptr.vmem [resolvable:$true] %s41_s18 }
   0x5   :  { %s3578_s19 = scalar_lea.vmem %s42_s18, 1024  ;;  %p3583_p1 = scmp.lt.s32.totalorder %s42_s18, %s42_s18 }
   0x6   :  { %p3579_p0 = scmp.ne.s32.totalorder %s42_s18, %s3578_s19  ;;  %p3584_p2 = scmp.lt.s32.totalorder %s3578_s19, %s3578_s19 }
   0x8   :  { %p3585_p3 = por %p3584_p2, %p3583_p1 }
   0xa   :  { %p3586_p4 = pnand %p3585_p3, %p3579_p0 }
   0xc   :  { %3589 = shalt.err (!%p3586_p4)
}
   0xd   :  { %s3699_s20 = smov 64   ;;  %s3700_s21 = smov 4  }
   0xe   :  { %47 = dma.hbm_to_vmem [thread:$0]  %s4677_s3, 1024, %s42_s18, [#allocation7], %s3699_s20, %s3699_s20, %s3700_s21  }
   0xf   :  { %s3701_s24 = smov [#allocation9]   ;;  %s3702_s26 = smov [#allocation3]  }
  0x10   :  { %s73_s25 = sshll.u32 %s3701_s24, 4  ;;  %s25_s27 = sshll.u32 %s3702_s26, 4  ;;  %s74_s25 = int_to_ptr.vmem [resolvable:$true] %s73_s25  ;;  %s26_s27 = int_to_ptr.vmem [resolvable:$true] %s25_s27 }
  0x11   :  { %s3598_s28 = scalar_lea.vmem %s74_s25, 1024  ;;  %p3603_p6 = scmp.lt.s32.totalorder %s74_s25, %s74_s25 }
  0x12   :  { %p3599_p5 = scmp.ne.s32.totalorder %s74_s25, %s3598_s28  ;;  %p3604_p7 = scmp.lt.s32.totalorder %s3598_s28, %s3598_s28 }
  0x14   :  { %p3605_p8 = por %p3604_p7, %p3603_p6 }
  0x16   :  { %p3606_p9 = pnand %p3605_p8, %p3599_p5 }
  0x18   :  { %3609 = shalt.err (!%p3606_p9)
}
  0x19   :  { %79 = dma.hbm_to_vmem [thread:$0]  %s4683_s9, 1024, %s74_s25, [#allocation10], %s3699_s20, %s3699_s20, %s3700_s21  }
  0x1a   :  { %s3618_s3 = scalar_lea.vmem %s26_s27, 2048  ;;  %p3623_p11 = scmp.lt.s32.totalorder %s26_s27, %s26_s27 }
  0x1b   :  { %p3619_p10 = scmp.ne.s32.totalorder %s26_s27, %s3618_s3  ;;  %p3624_p12 = scmp.lt.s32.totalorder %s3618_s3, %s3618_s3 }
  0x1d   :  { %p3625_p13 = por %p3624_p12, %p3623_p11 }
  0x1f   :  { %p3626_p0 = pnand %p3625_p13, %p3619_p10 }
  0x21   :  { %3629 = shalt.err (!%p3626_p0)
}
  0x22   :  { %s3703_s12 = smov 128   ;;  %s3704_s13 = smov 8  }
  0x23   :  { %31 = dma.hbm_to_vmem [thread:$0]  %s4674_s0, 2048, %s26_s27, [#allocation4], %s3703_s12, %s3703_s12, %s3704_s13  }
  0x24   :  { %s3705_s16 = smov [#allocation8]   ;;  %s3706_s9 = smov [#allocation11]  }
  0x25   :  { %s57_s17 = sshll.u32 %s3705_s16, 4  ;;  %s85_s18 = sshll.u32 %s3706_s9, 4  ;;  %s58_s17 = int_to_ptr.vmem [resolvable:$true] %s57_s17  ;;  %s86_s18 = int_to_ptr.vmem [resolvable:$true] %s85_s18 }
  0x26   :  { %s3638_s19 = scalar_lea.vmem %s58_s17, 9216  ;;  %p3643_p2 = scmp.lt.s32.totalorder %s58_s17, %s58_s17 }
  0x27   :  { %p3639_p1 = scmp.ne.s32.totalorder %s58_s17, %s3638_s19  ;;  %p3644_p3 = scmp.lt.s32.totalorder %s3638_s19, %s3638_s19 }
  0x29   :  { %p3645_p4 = por %p3644_p3, %p3643_p2 }
  0x2b   :  { %p3646_p5 = pnand %p3645_p4, %p3639_p1 }
  0x2d   :  { %3649 = shalt.err (!%p3646_p5)
}
  0x2e   :  { %63 = dma.hbm_to_vmem [thread:$0]  %s4680_s6, 9216, %s58_s17, [#allocation7], %s3699_s20, %s3699_s20, %s3700_s21  }
  0x2f   :  { %s3658_s0 = scalar_lea.vmem %s86_s18, 1024  ;;  %p3663_p7 = scmp.lt.s32.totalorder %s86_s18, %s86_s18 }
  0x30   :  { %p3659_p6 = scmp.ne.s32.totalorder %s86_s18, %s3658_s0  ;;  %p3664_p8 = scmp.lt.s32.totalorder %s3658_s0, %s3658_s0 }
  0x32   :  { %p3665_p9 = por %p3664_p8, %p3663_p7 }
  0x34   :  { %p3666_p10 = pnand %p3665_p9, %p3659_p6 }
  0x36   :  { %3669 = shalt.err (!%p3666_p10)
}
  0x37   :  { %91 = dma.hbm_to_vmem [thread:$0]  %s4684_s10, 1024, %s86_s18, [#allocation10], %s3699_s20, %s3699_s20, %s3700_s21  }
  0x38   :  { %3690 = dma.done.wait [#allocation4], 2048  }
  0x39   :  { %3691 = vsyncadd [#allocation4], 4294965248 }
  0x3a   :  { %3692 = dma.done.wait [#allocation7], 10240  }
  0x3b   :  { %3693 = vsyncadd [#allocation7], 4294957056 }
  0x3c   :  { %3694 = dma.done.wait [#allocation10], 2048  }
  0x3d   :  { %3695 = vsyncadd [#allocation10], 4294965248  ;;  %v3437_v0 = vld [vmem:[#allocation6 + $0x38] sm:$0xff]   ;;  %v3438_v1 = vld [vmem:[#allocation6 + $0x30] sm:$0xff]   ;;  %vm475_vm0 = vcmask 1040384   ;;  %vm736_vm5 = vcmask 1043456  }
  0x3e   :  { %3298 = vmatprep.subr.bf16.mxu0 %v3437_v0  ;;  %v3439_v2 = vld [vmem:[#allocation6 + $0x28] sm:$0xff]   ;;  %v3440_v3 = vld [vmem:[#allocation6 + $0x20] sm:$0xff]   ;;  %v110_v10 = vld [vmem:[#allocation3 + $0x10] sm:$0xff]  ;;  %vm476_vm1 = vsmask.f32 256 }
  0x3f   :  { %3299 = vmatpush3.bf16.msra.mxu0 %v3437_v0  ;;  %v108_v4 = vld [vmem:[#allocation3] sm:$0xff]  ;;  %v109_v5 = vld [vmem:[#allocation3 + $0x8] sm:$0xff]  ;;  %v111_v11 = vld [vmem:[#allocation3 + $0x18] sm:$0xff]  ;;  %vm526_vm2 = vsmask.f32 7938 }
  0x40   :  { %3300 = vmatprep.subr.bf16.mxu0 %v3438_v1  ;;  %v3802_v6 = vld [vmem:[%s4675_s1] ss:$0 sm:$0xff]  ;;  %v113_v15 = vld [vmem:[#allocation3 + $0x28] sm:$0xff]  ;;  %v114_v16 = vld [vmem:[#allocation3 + $0x30] sm:$0xff] }
  0x41   :  { %v131_v7 = vmul.f32 %v3802_v6, %v108_v4  ;;  %v132_v8 = vmul.f32 %v3802_v6, %v109_v5  ;;  %v3809_v9 = vld [vmem:[%s4676_s2] ss:$0 sm:$0xff]  ;;  %v133_v12 = vmul.f32 %v3802_v6, %v110_v10  ;;  %v134_v13 = vmul.f32 %v3802_v6, %v111_v11  ;;  %v3441_v17 = vld [vmem:[#allocation6 + $0x18] sm:$0xff]   ;;  %v117_v28 = vld [vmem:[#allocation3 + $0x48] sm:$0xff] }
  0x42   :  { %v112_v14 = vld [vmem:[#allocation3 + $0x20] sm:$0xff]  ;;  %v136_v21 = vmul.f32 %v3802_v6, %v113_v15  ;;  %v115_v22 = vld [vmem:[#allocation3 + $0x38] sm:$0xff]  ;;  %v137_v25 = vmul.f32 %v3802_v6, %v114_v16  ;;  %v118_v29 = vld [vmem:[#allocation3 + $0x50] sm:$0xff]  ;;  %v140_v48 = vmul.f32 %v3802_v6, %v117_v28 }
  0x43   :  { %3301 = vmatpush3.bf16.msra.mxu0 %v3438_v1  ;;  %v154_v18 = vadd.f32 %v3809_v9, %v131_v7  ;;  %v155_v19 = vadd.f32 %v3809_v9, %v132_v8  ;;  %v135_v20 = vmul.f32 %v3802_v6, %v112_v14  ;;  %v156_v23 = vadd.f32 %v3809_v9, %v133_v12  ;;  %v116_v27 = vld [vmem:[#allocation3 + $0x40] sm:$0xff]  ;;  %v119_v34 = vld [vmem:[#allocation3 + $0x58] sm:$0xff]  ;;  %v121_v36 = vld [vmem:[#allocation3 + $0x68] sm:$0xff] }
  0x44   :  { %3302 = vmatprep.subr.bf16.mxu0 %v3439_v2  ;;  %v157_v24 = vadd.f32 %v3809_v9, %v134_v13  ;;  %v138_v26 = vmul.f32 %v3802_v6, %v115_v22  ;;  %v159_v33 = vadd.f32 %v3809_v9, %v136_v21  ;;  %v120_v35 = vld [vmem:[#allocation3 + $0x60] sm:$0xff]  ;;  %v3442_v37 = vld [vmem:[#allocation6 + $0x10] sm:$0xff]   ;;  %v160_v42 = vadd.f32 %v3809_v9, %v137_v25  ;;  %v123_v44 = vld [vmem:[#allocation3 + $0x78] sm:$0xff] }
  0x45   :  { %v170_v30 = vmax.f32 %v154_v18, 0.0  ;;  %v171_v31 = vmax.f32 %v155_v19, 0.0  ;;  %v158_v32 = vadd.f32 %v3809_v9, %v135_v20  ;;  %v172_v38 = vmax.f32 %v156_v23, 0.0  ;;  %v122_v39 = vld [vmem:[#allocation3 + $0x70] sm:$0xff]  ;;  %v3443_v59 = vld [vmem:[#allocation6 + $0x8] sm:$0xff]   ;;  %v3445_v18 = vld [vmem:[#allocation8 + $0xf8] sm:$0xff]  }
  0x46   :  { %v173_v41 = vmax.f32 %v157_v24, 0.0  ;;  %v139_v43 = vmul.f32 %v3802_v6, %v116_v27  ;;  %v175_v46 = vmax.f32 %v159_v33, 0.0  ;;  %v161_v47 = vadd.f32 %v3809_v9, %v138_v26  ;;  %v3446_v19 = vld [vmem:[#allocation8 + $0xb8] sm:$0xff]   ;;  %vm3865_vm3 = vmand %vm475_vm0, %vm476_vm1  ;;  %v3449_v27 = vld [vmem:[#allocation8 + $0xf0] sm:$0xff]  }
  0x47   :  { %3303 = vmatpush3.bf16.msra.mxu0 %v3439_v2  ;;  %v3823_v40 = vpack.c.bf16 %v171_v31, %v170_v30  ;;  %v174_v45 = vmax.f32 %v158_v32, 0.0  ;;  %v141_v50 = vmul.f32 %v3802_v6, %v118_v29  ;;  %v142_v51 = vmul.f32 %v3802_v6, %v119_v34  ;;  %v3447_v20 = vld [vmem:[#allocation8 + $0x78] sm:$0xff]   ;;  %vm3872_vm4 = vmand %vm475_vm0, %vm526_vm2  ;;  %v478_v29 = vld [vmem:[#allocation2 + $0x8] sm:$0x1] }
  0x48   :  { %3304 = vmatprep.subr.bf16.mxu0 %v3440_v3  ;;  %v162_v49 = vadd.f32 %v3809_v9, %v139_v43  ;;  %v163_v52 = vadd.f32 %v3809_v9, %v140_v48  ;;  %v143_v53 = vmul.f32 %v3802_v6, %v120_v35  ;;  %v144_v54 = vmul.f32 %v3802_v6, %v121_v36  ;;  %v484_v22 = vld [vmem:[#allocation2 + $0x18] sm:$0x1]  ;;  %v534_v23 = vld [vmem:[#allocation2 + $0x1c] sm:$0x1]  ;;  %v528_v30 = vld [vmem:[#allocation2 + $0xc] sm:$0x1] }
  0x49   :  { %3314 = vmatprep.mubr.bf16.mxu0 %v3823_v40  ;;  %v176_v55 = vmax.f32 %v160_v42, 0.0  ;;  %v164_v56 = vadd.f32 %v3809_v9, %v141_v50  ;;  %v165_v57 = vadd.f32 %v3809_v9, %v142_v51  ;;  %v145_v58 = vmul.f32 %v3802_v6, %v122_v39  ;;  %2994 = vmatprep.subr.bf16.mxu1 %v3447_v20  ;;  %v3448_v26 = vld [vmem:[#allocation8 + $0x38] sm:$0xff]   ;;  %v3450_v31 = vld [vmem:[#allocation8 + $0xb0] sm:$0xff]   ;;  %v3453_v35 = vld [vmem:[#allocation8 + $0xe8] sm:$0xff]  }
  0x4a   :  { %v177_v60 = vmax.f32 %v161_v47, 0.0  ;;  %v166_v61 = vadd.f32 %v3809_v9, %v143_v53  ;;  %v167_v62 = vadd.f32 %v3809_v9, %v144_v54  ;;  %v146_v63 = vmul.f32 %v3802_v6, %v123_v44  ;;  %2995 = vmatpush3.bf16.msra.mxu1 %v3448_v26  ;;  %v3451_v34 = vld [vmem:[#allocation8 + $0x70] sm:$0xff]   ;;  %v487_v36 = vld [vmem:[#allocation2 + $0x20] sm:$0x1]  ;;  %v3454_v42 = vld [vmem:[#allocation8 + $0xa8] sm:$0xff]  }
  0x4b   :  { %3305 = vmatpush3.bf16.msra.mxu0 %v3440_v3  ;;  %v178_v0 = vmax.f32 %v162_v49, 0.0  ;;  %v179_v1 = vmax.f32 %v163_v52, 0.0  ;;  %v168_v2 = vadd.f32 %v3809_v9, %v145_v58  ;;  %v3444_v3 = vld [vmem:[#allocation6] sm:$0xff]   ;;  %v180_v4 = vmax.f32 %v164_v56, 0.0  ;;  %2996 = vmatprep.subr.bf16.mxu1 %v3451_v34  ;;  %v481_v43 = vld [vmem:[#allocation2 + $0x10] sm:$0x1]  ;;  %vm3969_vm6 = vmand %vm736_vm5, %vm526_vm2 }
  0x4c   :  { %3306 = vmatprep.subr.bf16.mxu0 %v3441_v17  ;;  %v181_v5 = vmax.f32 %v165_v57, 0.0  ;;  %v169_v7 = vadd.f32 %v3809_v9, %v146_v63  ;;  %v182_v8 = vmax.f32 %v166_v61, 0.0  ;;  %v183_v10 = vmax.f32 %v167_v62, 0.0  ;;  %v531_v44 = vld [vmem:[#allocation2 + $0x14] sm:$0x1]  ;;  %v3455_v47 = vld [vmem:[#allocation8 + $0x68] sm:$0xff]  }
  0x4d   :  { %v184_v11 = vmax.f32 %v168_v2, 0.0  ;;  %v3844_v13 = vpack.c.bf16 %v173_v41, %v172_v38  ;;  %v3846_v6 = vpack.c.bf16 %v175_v46, %v174_v45  ;;  %v3850_v14 = vpack.c.bf16 %v177_v60, %v176_v55  ;;  %v3452_v38 = vld [vmem:[#allocation8 + $0x30] sm:$0xff]   ;;  %v490_v48 = vld [vmem:[#allocation2 + $0x28] sm:$0x1]  ;;  %v540_v49 = vld [vmem:[#allocation2 + $0x2c] sm:$0x1] }
  0x4e   :  { %v185_v12 = vmax.f32 %v169_v7, 0.0  ;;  %v3852_v9 = vpack.c.bf16 %v179_v1, %v178_v0  ;;  %v3856_v15 = vpack.c.bf16 %v181_v5, %v180_v4  ;;  %v3858_v16 = vpack.c.bf16 %v183_v10, %v182_v8  ;;  %2997 = vmatpush3.bf16.msra.mxu1 %v3452_v38  ;;  %v3456_v50 = vld [vmem:[#allocation8 + $0x28] sm:$0xff]   ;;  %v496_v51 = vld [vmem:[#allocation2 + $0x38] sm:$0x1]  ;;  %v546_v52 = vld [vmem:[#allocation2 + $0x3c] sm:$0x1] }
  0x4f   :  { %3307 = vmatpush3.bf16.msra.mxu0 %v3441_v17  ;;  %v485_v24 = vsel %vm3865_vm3, 0, %v484_v22  ;;  %v535_v28 = vsel %vm3872_vm4, 0, %v534_v23  ;;  %v479_v32 = vsel %vm3865_vm3, 0, %v478_v29  ;;  %v529_v33 = vsel %vm3872_vm4, 0, %v528_v30  ;;  %2998 = vmatprep.subr.bf16.mxu1 %v3455_v47  ;;  %v3457_v57 = vld [vmem:[#allocation8 + $0xe0] sm:$0xff]   ;;  %v3461_v0 = vld [vmem:[#allocation8 + $0xd8] sm:$0xff]  }
  0x50   :  { %3308 = vmatprep.subr.bf16.mxu0 %v3442_v37  ;;  %4701 = vst [vmem:[#allocation17_spill] sm:$0xff] %v3852_v9  ;;  %4702 = vst [vmem:[#allocation18_spill] sm:$0xff] %v3856_v15  ;;  %v3862_v17 = vpack.c.bf16 %v185_v12, %v184_v11  ;;  %v488_v39 = vsel %vm3865_vm3, 0, %v487_v36  ;;  %v482_v45 = vsel %vm3865_vm3, 0, %v481_v43  ;;  %v532_v46 = vsel %vm3872_vm4, 0, %v531_v44  ;;  %v3458_v58 = vld [vmem:[#allocation8 + $0xa0] sm:$0xff]  }
  0x51   :  { %4703 = vst [vmem:[#allocation19_spill] sm:$0xff] %v3858_v16  ;;  %486 = vst [vmem:[#allocation2 + $0x18] sm:$0x1] %v485_v24  ;;  %v497_v53 = vsel %vm3865_vm3, 0, %v496_v51  ;;  %v547_v54 = vsel %vm3872_vm4, 0, %v546_v52  ;;  %v491_v55 = vsel %vm3865_vm3, 0, %v490_v48 }
  0x52   :  { %4704 = vst [vmem:[#allocation20_spill] sm:$0xff] %v3862_v17  ;;  %536 = vst [vmem:[#allocation2 + $0x1c] sm:$0x1] %v535_v28  ;;  %v541_v56 = vsel %vm3872_vm4, 0, %v540_v49  ;;  %2999 = vmatpush3.bf16.msra.mxu1 %v3456_v50  ;;  %v499_v60 = vld [vmem:[#allocation2 + $0x40] sm:$0x1] }
  0x53   :  { %3309 = vmatpush3.bf16.msra.mxu0 %v3442_v37  ;;  %480 = vst [vmem:[#allocation2 + $0x8] sm:$0x1] %v479_v32  ;;  %530 = vst [vmem:[#allocation2 + $0xc] sm:$0x1] %v529_v33  ;;  %v537_v37 = vld [vmem:[#allocation2 + $0x24] sm:$0x1] }
  0x54   :  { %3310 = vmatprep.subr.bf16.mxu0 %v3443_v59  ;;  %v538_v41 = vsel %vm3872_vm4, 0, %v537_v37  ;;  %489 = vst [vmem:[#allocation2 + $0x20] sm:$0x1] %v488_v39  ;;  %483 = vst [vmem:[#allocation2 + $0x10] sm:$0x1] %v482_v45  ;;  %v500_v61 = vsel %vm3865_vm3, 0, %v499_v60 }
  0x55   :  { %539 = vst [vmem:[#allocation2 + $0x24] sm:$0x1] %v538_v41  ;;  %533 = vst [vmem:[#allocation2 + $0x14] sm:$0x1] %v532_v46  ;;  %v549_v62 = vld [vmem:[#allocation2 + $0x44] sm:$0x1] }
  0x56   :  { %498 = vst [vmem:[#allocation2 + $0x38] sm:$0x1] %v497_v53  ;;  %548 = vst [vmem:[#allocation2 + $0x3c] sm:$0x1] %v547_v54  ;;  %v3460_v63 = vld [vmem:[#allocation8 + $0x20] sm:$0xff]   ;;  %v550_v1 = vsel %vm3872_vm4, 0, %v549_v62 }
  0x57   :  { %3311 = vmatpush3.bf16.msra.mxu0 %v3443_v59  ;;  %492 = vst [vmem:[#allocation2 + $0x28] sm:$0x1] %v491_v55  ;;  %542 = vst [vmem:[#allocation2 + $0x2c] sm:$0x1] %v541_v56  ;;  %v3459_v59 = vld [vmem:[#allocation8 + $0x60] sm:$0xff]   ;;  %v3462_v2 = vld [vmem:[#allocation8 + $0x98] sm:$0xff]  }
  0x58   :  { %3312 = vmatprep.subr.bf16.mxu0 %v3444_v3  ;;  %3000 = vmatprep.subr.bf16.mxu1 %v3459_v59  ;;  %501 = vst [vmem:[#allocation2 + $0x40] sm:$0x1] %v500_v61  ;;  %551 = vst [vmem:[#allocation2 + $0x44] sm:$0x1] %v550_v1  ;;  %v543_v4 = vld [vmem:[#allocation2 + $0x34] sm:$0x1] }
  0x59   :  { %3001 = vmatpush3.bf16.msra.mxu1 %v3460_v63  ;;  %v3463_v5 = vld [vmem:[#allocation8 + $0x58] sm:$0xff]   ;;  %v544_v8 = vsel %vm3872_vm4, 0, %v543_v4  ;;  %v3465_v11 = vld [vmem:[#allocation8 + $0xd0] sm:$0xff]   ;;  %v3470_v22 = vld [vmem:[#allocation8 + $0x88] sm:$0xff]   ;;  %v3707_v23 = vmov 0  }
  0x5a   :  { %v3464_v10 = vld [vmem:[#allocation8 + $0x18] sm:$0xff]   ;;  %545 = vst [vmem:[#allocation2 + $0x34] sm:$0x1] %v544_v8  ;;  %3002 = vmatprep.subr.bf16.mxu1 %v3463_v5  ;;  %v3466_v12 = vld [vmem:[#allocation8 + $0x90] sm:$0xff]   ;;  %465 = vst [vmem:[#allocation2] sm:$0xf] %v3707_v23 }
  0x5b   :  { %3313 = vmatpush3.bf16.msra.mxu0 %v3444_v3  ;;  %v493_v3 = vld [vmem:[#allocation2 + $0x30] sm:$0x1]  ;;  %466 = vst [vmem:[#allocation2 + $0x4] sm:$0x1] %v3707_v23  ;;  %467 = vst [vmem:[#allocation2 + $0x50] sm:$0xf] %v3707_v23 }
  0x5c   :  { %3058 = vmatprep.subr.bf16.mxu0 %v3445_v18  ;;  %v494_v7 = vsel %vm3865_vm3, 0, %v493_v3  ;;  %v3467_v18 = vld [vmem:[#allocation8 + $0x50] sm:$0xff]   ;;  %468 = vst [vmem:[#allocation2 + $0x54] sm:$0x1] %v3707_v23  ;;  %470 = vst [vmem:[#allocation2 + $0x48] sm:$0xf] %v3707_v23 }
  0x5d   :  { %495 = vst [vmem:[#allocation2 + $0x30] sm:$0x1] %v494_v7  ;;  %3003 = vmatpush3.bf16.msra.mxu1 %v3464_v10  ;;  %v3468_v20 = vld [vmem:[#allocation8 + $0x10] sm:$0xff]   ;;  %471 = vst [vmem:[#allocation2 + $0x4c] sm:$0x1] %v3707_v23  ;;  %v3472_v30 = vld [vmem:[#allocation8 + $0x8] sm:$0xff]  }
  0x5e   :  { %3315 = vmatmul.mubr.bf16.vlgmr.msra.gmra.mxu0 %v3844_v13  ;;  %3004 = vmatprep.subr.bf16.mxu1 %v3467_v18  ;;  %472 = vst [vmem:[#allocation2 + $0x98] sm:$0xf] %v3707_v23  ;;  %473 = vst [vmem:[#allocation2 + $0x9c] sm:$0x1] %v3707_v23  ;;  %v508_v24 = vld [vmem:[#allocation2 + $0x68] sm:$0x1] }
  0x5f   :  { %3318 = vmatprep.mubr.bf16.mxu0 %v3846_v6  ;;  %3059 = vmatpush3.bf16.msra.mxu0 %v3446_v19  ;;  %v3469_v19 = vld [vmem:[#allocation8 + $0xc8] sm:$0xff]   ;;  %v509_v28 = vsel %vm3865_vm3, 0, %v508_v24  ;;  %v3474_v32 = vld [vmem:[#allocation8 + $0x80] sm:$0xff]   ;;  %v502_v33 = vld [vmem:[#allocation2 + $0x58] sm:$0x1] }
  0x60   :  { %3060 = vmatprep.subr.bf16.mxu0 %v3449_v27  ;;  %v558_v26 = vld [vmem:[#allocation2 + $0x6c] sm:$0x1]  ;;  %510 = vst [vmem:[#allocation2 + $0x68] sm:$0x1] %v509_v28  ;;  %v552_v34 = vld [vmem:[#allocation2 + $0x5c] sm:$0x1] }
  0x61   :  { %3005 = vmatpush3.bf16.msra.mxu1 %v3468_v20  ;;  %v3471_v27 = vld [vmem:[#allocation8 + $0x48] sm:$0xff]   ;;  %v559_v29 = vsel %vm3872_vm4, 0, %v558_v26  ;;  %v503_v36 = vsel %vm3865_vm3, 0, %v502_v33  ;;  %v553_v37 = vsel %vm3872_vm4, 0, %v552_v34  ;;  %v561_v39 = vld [vmem:[#allocation2 + $0x74] sm:$0x1] }
  0x62   :  { %560 = vst [vmem:[#allocation2 + $0x6c] sm:$0x1] %v559_v29  ;;  %3006 = vmatprep.subr.bf16.mxu1 %v3471_v27  ;;  %v3475_v41 = vld [vmem:[#allocation8 + $0x40] sm:$0xff]   ;;  %504 = vst [vmem:[#allocation2 + $0x58] sm:$0x1] %v503_v36  ;;  %v3484_v56 = vld [vmem:[#allocation8 + $0x178] sm:$0xff]  }
  0x63   :  { %3061 = vmatpush3.bf16.msra.mxu0 %v3450_v31  ;;  %v3473_v31 = vld [vmem:[#allocation8 + $0xc0] sm:$0xff]   ;;  %554 = vst [vmem:[#allocation2 + $0x5c] sm:$0x1] %v553_v37  ;;  %v514_v47 = vld [vmem:[#allocation2 + $0x78] sm:$0x1] }
  0x64   :  { %3062 = vmatprep.subr.bf16.mxu0 %v3453_v35  ;;  %v511_v35 = vld [vmem:[#allocation2 + $0x70] sm:$0x1]  ;;  %v505_v43 = vld [vmem:[#allocation2 + $0x60] sm:$0x1]  ;;  %v555_v44 = vld [vmem:[#allocation2 + $0x64] sm:$0x1] }
  0x65   :  { %3007 = vmatpush3.bf16.msra.mxu1 %v3472_v30  ;;  %v512_v38 = vsel %vm3865_vm3, 0, %v511_v35  ;;  %v506_v45 = vsel %vm3865_vm3, 0, %v505_v43  ;;  %v556_v46 = vsel %vm3872_vm4, 0, %v555_v44  ;;  %v564_v48 = vld [vmem:[#allocation2 + $0x7c] sm:$0x1]  ;;  %v515_v49 = vsel %vm3865_vm3, 0, %v514_v47 }
  0x66   :  { %3319 = vmatmul.mubr.bf16.gmra.mxu0 %v3850_v14  ;;  %513 = vst [vmem:[#allocation2 + $0x70] sm:$0x1] %v512_v38  ;;  %3008 = vmatprep.subr.bf16.mxu1 %v3475_v41  ;;  %507 = vst [vmem:[#allocation2 + $0x60] sm:$0x1] %v506_v45  ;;  %v565_v50 = vsel %vm3872_vm4, 0, %v564_v48  ;;  %v3479_v53 = vld [vmem:[#allocation8] sm:$0xff]  }
  0x67   :  { %3322 = vmatprep.mubr.bf16.mxu0 %v3852_v9  ;;  %3063 = vmatpush3.bf16.msra.mxu0 %v3454_v42  ;;  %v562_v42 = vsel %vm3872_vm4, 0, %v561_v39  ;;  %557 = vst [vmem:[#allocation2 + $0x64] sm:$0x1] %v556_v46  ;;  %516 = vst [vmem:[#allocation2 + $0x78] sm:$0x1] %v515_v49  ;;  %v3505_v1 = vld [vmem:[#allocation8 + $0x1f8] sm:$0xff]  }
  0x68   :  { %3064 = vmatprep.subr.bf16.mxu0 %v3457_v57  ;;  %563 = vst [vmem:[#allocation2 + $0x74] sm:$0x1] %v562_v42  ;;  %566 = vst [vmem:[#allocation2 + $0x7c] sm:$0x1] %v565_v50  ;;  %v520_v51 = vld [vmem:[#allocation2 + $0x88] sm:$0x1] }
  0x69   :  { %v570_v52 = vld [vmem:[#allocation2 + $0x8c] sm:$0x1]  ;;  %v521_v54 = vsel %vm3865_vm3, 0, %v520_v51  ;;  %3009 = vmatpush3.bf16.msra.mxu1 %v3479_v53  ;;  %v523_v57 = vld [vmem:[#allocation2 + $0x90] sm:$0x1] }
  0x6a   :  { %v571_v55 = vsel %vm3872_vm4, 0, %v570_v52  ;;  %522 = vst [vmem:[#allocation2 + $0x88] sm:$0x1] %v521_v54  ;;  %3122 = vmatprep.subr.bf16.mxu1 %v3484_v56  ;;  %v524_v59 = vsel %vm3865_vm3, 0, %v523_v57  ;;  %v517_v61 = vld [vmem:[#allocation2 + $0x80] sm:$0x1] }
  0x6b   :  { %3065 = vmatpush3.bf16.msra.mxu0 %v3458_v58  ;;  %572 = vst [vmem:[#allocation2 + $0x8c] sm:$0x1] %v571_v55  ;;  %v573_v58 = vld [vmem:[#allocation2 + $0x94] sm:$0x1]  ;;  %525 = vst [vmem:[#allocation2 + $0x90] sm:$0x1] %v524_v59 }
  0x6c   :  { %3066 = vmatprep.subr.bf16.mxu0 %v3461_v0  ;;  %v574_v60 = vsel %vm3872_vm4, 0, %v573_v58  ;;  %v518_v62 = vsel %vm3865_vm3, 0, %v517_v61  ;;  %v567_v63 = vld [vmem:[#allocation2 + $0x84] sm:$0x1]  ;;  %v3943_v3 = vld [vmem:[#allocation2] sm:$0xf] }
  0x6d   :  { %575 = vst [vmem:[#allocation2 + $0x94] sm:$0x1] %v574_v60  ;;  %519 = vst [vmem:[#allocation2 + $0x80] sm:$0x1] %v518_v62  ;;  %v568_v0 = vsel %vm3872_vm4, 0, %v567_v63 }
  0x6e   :  { %3323 = vmatmul.mubr.bf16.gmra.mxu0 %v3856_v15  ;;  %569 = vst [vmem:[#allocation2 + $0x84] sm:$0x1] %v568_v0  ;;  %v835_v4 = vld [vmem:[#allocation2 + $0x4] sm:$0x1]  ;;  %v3948_v7 = vld [vmem:[%s4679_s5] ss:$0 sm:$0xff] }
  0x6f   :  { %3326 = vmatprep.mubr.bf16.mxu0 %v3858_v16  ;;  %3067 = vmatpush3.bf16.msra.mxu0 %v3462_v2  ;;  %v3941_v2 = vld [vmem:[%s4678_s4] ss:$0 sm:$0xff]  ;;  %v3952_v10 = vcombine.low %v3943_v3, %v835_v4  ;;  %v750_v46 = vld [vmem:[#allocation2 + $0x18] sm:$0xf]  ;;  %v753_v47 = vld [vmem:[#allocation2 + $0x1c] sm:$0x1] }
  0x70   :  { %3068 = vmatprep.subr.bf16.mxu0 %v3465_v11  ;;  %v738_v57 = vld [vmem:[#allocation2 + $0x8] sm:$0xf]  ;;  %v741_v58 = vld [vmem:[#allocation2 + $0xc] sm:$0x1]  ;;  %v3510_v16 = vld [vmem:[#allocation8 + $0x158] sm:$0xff]  }
  0x71   :  { %v957_v24 = vshll.u32 %v3952_v10, 16  ;;  %v1066_v34 = vrot.slane %v3952_v10, 1  ;;  %v955_v38 = vshrl.u32 %v3952_v10, 16 }
  0x73   :  { %3069 = vmatpush3.bf16.msra.mxu0 %v3466_v12  ;;  %v3965_v39 = vrot.slane %v957_v24, 1 }
  0x74   :  { %3070 = vmatprep.subr.bf16.mxu0 %v3469_v19 }
  0x76   :  { %3327 = vmatmul.mubr.bf16.gmra.mxu0 %v3862_v17 }
  0x77   :  { %3071 = vmatpush3.bf16.msra.mxu0 %v3470_v22 }
  0x78   :  { %3072 = vmatprep.subr.bf16.mxu0 %v3473_v31 }
  0x7b   :  { %3073 = vmatpush3.bf16.msra.mxu0 %v3474_v32 }
  0x7c   :  { %3186 = vmatprep.subr.bf16.mxu0 %v3505_v1 }
 0x11e   :  { %v3316_v5 = vpop.f32.mrf.mxu0 }
 0x11f   :  { %v364_v25 = vmul.f32 %v3316_v5, %v3941_v2 }
 0x120   :  { %v292_v8 = vpop.f32.mrf.mxu0 }
 0x121   :  { %v387_v11 = vadd.f32 %v3948_v7, %v364_v25  ;;  %v362_v12 = vmul.f32 %v3941_v2, %v292_v8 }
 0x122   :  { %v3317_v18 = vpop.f32.mrf.mxu0 }
 0x123   :  { %v403_v19 = vmax.f32 %v387_v11, 0.0  ;;  %v385_v20 = vadd.f32 %v3948_v7, %v362_v12  ;;  %v365_v22 = vmul.f32 %v3317_v18, %v3941_v2 }
 0x124   :  { %v295_v23 = vpop.f32.mrf.mxu0 }
 0x125   :  { %v2964_v26 = vpack.c.bf16 %v403_v19, %v403_v19  ;;  %v401_v27 = vmax.f32 %v385_v20, 0.0  ;;  %v388_v28 = vadd.f32 %v3948_v7, %v365_v22  ;;  %v363_v29 = vmul.f32 %v3941_v2, %v295_v23  ;;  %v756_v22 = vld [vmem:[#allocation2 + $0x20] sm:$0xf]  ;;  %v759_v23 = vld [vmem:[#allocation2 + $0x24] sm:$0x1] }
 0x126   :  { %v3320_v30 = vpop.f32.mrf.mxu0 }
 0x127   :  { %v593_v31 = vshrl.u32 %v2964_v26, 16  ;;  %v2962_v32 = vpack.c.bf16 %v401_v27, %v401_v27  ;;  %v404_v33 = vmax.f32 %v388_v28, 0.0  ;;  %v386_v35 = vadd.f32 %v3948_v7, %v363_v29 }
 0x128   :  { %v368_v36 = vmul.f32 %v3320_v30, %v3941_v2  ;;  %v308_v37 = vpop.f32.mrf.mxu0  ;;  %v596_v42 = vshll.u32 %v2964_v26, 16 }
 0x129   :  { %v595_v41 = vrot.slane %v593_v31, 7  ;;  %v577_v43 = vshrl.u32 %v2962_v32, 16  ;;  %v2965_v44 = vpack.c.bf16 %v404_v33, %v404_v33  ;;  %v580_v48 = vshll.u32 %v2962_v32, 16  ;;  %v744_v32 = vld [vmem:[#allocation2 + $0x10] sm:$0xf] }
 0x12a   :  { %v402_v49 = vmax.f32 %v386_v35, 0.0  ;;  %v391_v50 = vadd.f32 %v3948_v7, %v368_v36  ;;  %v366_v51 = vmul.f32 %v3941_v2, %v308_v37  ;;  %v3321_v52 = vpop.f32.mrf.mxu0  ;;  %v747_v33 = vld [vmem:[#allocation2 + $0x14] sm:$0x1] }
 0x12b   :  { %v598_v53 = vor.u32 %v596_v42, %v595_v41  ;;  %v599_v54 = vrot.slane %v595_v41, 4  ;;  %v579_v55 = vrot.slane %v577_v43, 7  ;;  %v601_v56 = vshrl.u32 %v2965_v44, 16 }
 0x12c   :  { %v604_v59 = vshll.u32 %v2965_v44, 16  ;;  %v2963_v60 = vpack.c.bf16 %v402_v49, %v402_v49  ;;  %v407_v61 = vmax.f32 %v391_v50, 0.0  ;;  %v389_v62 = vadd.f32 %v3948_v7, %v366_v51  ;;  %v311_v63 = vpop.f32.mrf.mxu0 }
 0x12d   :  { %v751_v0 = vsel %vm3969_vm6, %v598_v53, %v750_v46  ;;  %v754_v1 = vsel %vm3865_vm3, %v599_v54, %v753_v47  ;;  %v582_v4 = vor.u32 %v580_v48, %v579_v55  ;;  %v583_v5 = vrot.slane %v579_v55, 4  ;;  %v774_v54 = vld [vmem:[#allocation2 + $0x38] sm:$0xf]  ;;  %v777_v55 = vld [vmem:[#allocation2 + $0x3c] sm:$0x1] }
 0x12e   :  { %752 = vst [vmem:[#allocation2 + $0x18] sm:$0xf] %v751_v0  ;;  %755 = vst [vmem:[#allocation2 + $0x1c] sm:$0x1] %v754_v1  ;;  %v603_v25 = vrot.slane %v601_v56, 7  ;;  %v585_v8 = vshrl.u32 %v2963_v60, 16  ;;  %v2968_v12 = vpack.c.bf16 %v407_v61, %v407_v61  ;;  %v3324_v18 = vpop.f32.mrf.mxu0  ;;  %v369_v26 = vmul.f32 %v3321_v52, %v3941_v2 }
 0x12f   :  { %v588_v11 = vshll.u32 %v2963_v60, 16  ;;  %v739_v19 = vsel %vm3969_vm6, %v582_v4, %v738_v57  ;;  %v742_v20 = vsel %vm3865_vm3, %v583_v5, %v741_v58  ;;  %v405_v24 = vmax.f32 %v389_v62, 0.0  ;;  %v762_v62 = vld [vmem:[#allocation2 + $0x28] sm:$0xf] }
 0x130   :  { %740 = vst [vmem:[#allocation2 + $0x8] sm:$0xf] %v739_v19  ;;  %743 = vst [vmem:[#allocation2 + $0xc] sm:$0x1] %v742_v20  ;;  %v606_v27 = vor.u32 %v604_v59, %v603_v25  ;;  %v607_v28 = vrot.slane %v603_v25, 4  ;;  %v587_v29 = vrot.slane %v585_v8, 7  ;;  %v324_v31 = vpop.f32.mrf.mxu0  ;;  %v392_v37 = vadd.f32 %v3948_v7, %v369_v26 }
 0x131   :  { %v625_v30 = vshrl.u32 %v2968_v12, 16  ;;  %v628_v35 = vshll.u32 %v2968_v12, 16  ;;  %v2966_v36 = vpack.c.bf16 %v405_v24, %v405_v24  ;;  %v367_v41 = vmul.f32 %v3941_v2, %v311_v63  ;;  %v765_v63 = vld [vmem:[#allocation2 + $0x2c] sm:$0x1] }
 0x132   :  { %v757_v42 = vsel %vm3969_vm6, %v606_v27, %v756_v22  ;;  %v760_v43 = vsel %vm3865_vm3, %v607_v28, %v759_v23  ;;  %v590_v44 = vor.u32 %v588_v11, %v587_v29  ;;  %v591_v46 = vrot.slane %v587_v29, 4  ;;  %v3325_v47 = vpop.f32.mrf.mxu0 }
 0x133   :  { %758 = vst [vmem:[#allocation2 + $0x20] sm:$0xf] %v757_v42  ;;  %761 = vst [vmem:[#allocation2 + $0x24] sm:$0x1] %v760_v43  ;;  %v627_v48 = vrot.slane %v625_v30, 7  ;;  %v609_v49 = vshrl.u32 %v2966_v36, 16  ;;  %v390_v56 = vadd.f32 %v3948_v7, %v367_v41  ;;  %v372_v57 = vmul.f32 %v3324_v18, %v3941_v2 }
 0x134   :  { %v612_v50 = vshll.u32 %v2966_v36, 16  ;;  %v408_v51 = vmax.f32 %v392_v37, 0.0  ;;  %v745_v52 = vsel %vm3969_vm6, %v590_v44, %v744_v32  ;;  %v748_v53 = vsel %vm3865_vm3, %v591_v46, %v747_v33  ;;  %v327_v25 = vpop.f32.mrf.mxu0  ;;  %v783_v36 = vld [vmem:[#allocation2 + $0x44] sm:$0x1] }
 0x135   :  { %746 = vst [vmem:[#allocation2 + $0x10] sm:$0xf] %v745_v52  ;;  %749 = vst [vmem:[#allocation2 + $0x14] sm:$0x1] %v748_v53  ;;  %v630_v58 = vor.u32 %v628_v35, %v627_v48  ;;  %v631_v59 = vrot.slane %v627_v48, 4  ;;  %v611_v60 = vrot.slane %v609_v49, 7  ;;  %v395_v1 = vadd.f32 %v3948_v7, %v372_v57 }
 0x136   :  { %v2969_v61 = vpack.c.bf16 %v408_v51, %v408_v51  ;;  %v406_v0 = vmax.f32 %v390_v56, 0.0  ;;  %v370_v4 = vmul.f32 %v3941_v2, %v324_v31  ;;  %v373_v5 = vmul.f32 %v3325_v47, %v3941_v2  ;;  %v3328_v33 = vpop.f32.mrf.mxu0  ;;  %v780_v35 = vld [vmem:[#allocation2 + $0x40] sm:$0xf]  ;;  %v768_v49 = vld [vmem:[#allocation2 + $0x30] sm:$0xf] }
 0x137   :  { %v775_v8 = vsel %vm3969_vm6, %v630_v58, %v774_v54  ;;  %v778_v11 = vsel %vm3865_vm3, %v631_v59, %v777_v55  ;;  %v614_v12 = vor.u32 %v612_v50, %v611_v60  ;;  %v615_v18 = vrot.slane %v611_v60, 4  ;;  %v771_v50 = vld [vmem:[#allocation2 + $0x34] sm:$0x1]  ;;  %v4017_v59 = vld [vmem:[#allocation2 + $0x8] sm:$0xf] }
 0x138   :  { %776 = vst [vmem:[#allocation2 + $0x38] sm:$0xf] %v775_v8  ;;  %779 = vst [vmem:[#allocation2 + $0x3c] sm:$0x1] %v778_v11  ;;  %v633_v19 = vshrl.u32 %v2969_v61, 16  ;;  %v636_v20 = vshll.u32 %v2969_v61, 16  ;;  %v2967_v22 = vpack.c.bf16 %v406_v0, %v406_v0  ;;  %v393_v27 = vadd.f32 %v3948_v7, %v370_v4  ;;  %v340_v0 = vpop.f32.mrf.mxu0 }
 0x139   :  { %v411_v23 = vmax.f32 %v395_v1, 0.0  ;;  %v763_v24 = vsel %vm3969_vm6, %v614_v12, %v762_v62  ;;  %v766_v26 = vsel %vm3865_vm3, %v615_v18, %v765_v63  ;;  %v396_v28 = vadd.f32 %v3948_v7, %v373_v5  ;;  %v837_v1 = vld [vmem:[#allocation2 + $0xc] sm:$0x1] }
 0x13a   :  { %764 = vst [vmem:[#allocation2 + $0x28] sm:$0xf] %v763_v24  ;;  %767 = vst [vmem:[#allocation2 + $0x2c] sm:$0x1] %v766_v26  ;;  %v635_v29 = vrot.slane %v633_v19, 7  ;;  %v617_v30 = vshrl.u32 %v2967_v22, 16  ;;  %v371_v42 = vmul.f32 %v3941_v2, %v327_v25  ;;  %v376_v43 = vmul.f32 %v3328_v33, %v3941_v2 }
 0x13b   :  { %v620_v31 = vshll.u32 %v2967_v22, 16  ;;  %v2972_v32 = vpack.c.bf16 %v411_v23, %v411_v23  ;;  %v409_v37 = vmax.f32 %v393_v27, 0.0  ;;  %v412_v41 = vmax.f32 %v396_v28, 0.0  ;;  %v798_v25 = vld [vmem:[#allocation2 + $0x68] sm:$0xf] }
 0x13c   :  { %v638_v44 = vor.u32 %v636_v20, %v635_v29  ;;  %v639_v46 = vrot.slane %v635_v29, 4  ;;  %v619_v47 = vrot.slane %v617_v30, 7  ;;  %v394_v54 = vadd.f32 %v3948_v7, %v371_v42  ;;  %v801_v8 = vld [vmem:[#allocation2 + $0x6c] sm:$0x1]  ;;  %v786_v23 = vld [vmem:[#allocation2 + $0x58] sm:$0xf] }
 0x13d   :  { %v657_v48 = vshrl.u32 %v2972_v32, 16  ;;  %v660_v51 = vshll.u32 %v2972_v32, 16  ;;  %v2970_v52 = vpack.c.bf16 %v409_v37, %v409_v37  ;;  %v2973_v53 = vpack.c.bf16 %v412_v41, %v412_v41  ;;  %v789_v24 = vld [vmem:[#allocation2 + $0x5c] sm:$0x1]  ;;  %v804_v26 = vld [vmem:[#allocation2 + $0x70] sm:$0xf] }
 0x13e   :  { %v781_v55 = vsel %vm3969_vm6, %v638_v44, %v780_v35  ;;  %v784_v56 = vsel %vm3865_vm3, %v639_v46, %v783_v36  ;;  %v622_v57 = vor.u32 %v620_v31, %v619_v47  ;;  %v623_v58 = vrot.slane %v619_v47, 4  ;;  %v807_v36 = vld [vmem:[#allocation2 + $0x74] sm:$0x1]  ;;  %v4032_v37 = vld [vmem:[#allocation2 + $0x18] sm:$0xf] }
 0x13f   :  { %782 = vst [vmem:[#allocation2 + $0x40] sm:$0xf] %v781_v55  ;;  %785 = vst [vmem:[#allocation2 + $0x44] sm:$0x1] %v784_v56  ;;  %v659_v60 = vrot.slane %v657_v48, 7  ;;  %v641_v61 = vshrl.u32 %v2970_v52, 16  ;;  %v399_v28 = vadd.f32 %v3948_v7, %v376_v43  ;;  %v374_v29 = vmul.f32 %v3941_v2, %v340_v0 }
 0x140   :  { %v644_v62 = vshll.u32 %v2970_v52, 16  ;;  %v665_v63 = vshrl.u32 %v2973_v53, 16  ;;  %v769_v4 = vsel %vm3969_vm6, %v622_v57, %v768_v49  ;;  %v772_v5 = vsel %vm3865_vm3, %v623_v58, %v771_v50  ;;  %v4034_v46 = vld [vmem:[#allocation2 + $0x10] sm:$0xf]  ;;  %v841_v52 = vld [vmem:[#allocation2 + $0x1c] sm:$0x1] }
 0x141   :  { %v668_v11 = vshll.u32 %v2973_v53, 16  ;;  %v410_v12 = vmax.f32 %v394_v54, 0.0  ;;  %770 = vst [vmem:[#allocation2 + $0x30] sm:$0xf] %v769_v4  ;;  %773 = vst [vmem:[#allocation2 + $0x34] sm:$0x1] %v772_v5  ;;  %v662_v18 = vor.u32 %v660_v51, %v659_v60  ;;  %v4026_v30 = vcombine.low %v4017_v59, %v837_v1 }
 0x142   :  { %v663_v19 = vrot.slane %v659_v60, 4  ;;  %v643_v20 = vrot.slane %v641_v61, 7  ;;  %v667_v22 = vrot.slane %v665_v63, 7  ;;  %v415_v49 = vmax.f32 %v399_v28, 0.0  ;;  %v839_v51 = vld [vmem:[#allocation2 + $0x14] sm:$0x1] }
 0x143   :  { %v2971_v27 = vpack.c.bf16 %v410_v12, %v410_v12  ;;  %v799_v31 = vsel %vm3969_vm6, %v662_v18, %v798_v25  ;;  %v397_v50 = vadd.f32 %v3948_v7, %v374_v29  ;;  %v792_v56 = vld [vmem:[#allocation2 + $0x60] sm:$0xf]  ;;  %v795_v57 = vld [vmem:[#allocation2 + $0x64] sm:$0x1]  ;;  %v4048_v58 = vor.u32 %v3965_v39, %v955_v38  ;;  %v3509_v39 = vld [vmem:[#allocation8 + $0x1b8] sm:$0xff]  }
 0x144   :  { %v802_v32 = vsel %vm3865_vm3, %v663_v19, %v801_v8  ;;  %v646_v33 = vor.u32 %v644_v62, %v643_v20  ;;  %v647_v35 = vrot.slane %v643_v20, 4  ;;  %800 = vst [vmem:[#allocation2 + $0x68] sm:$0xf] %v799_v31  ;;  %v670_v41 = vor.u32 %v668_v11, %v667_v22  ;;  %v4053_v0 = vld [vmem:[#allocation2 + $0x20] sm:$0xf]  ;;  %v3513_v19 = vld [vmem:[#allocation8 + $0x1f0] sm:$0xff]  }
 0x145   :  { %803 = vst [vmem:[#allocation2 + $0x6c] sm:$0x1] %v802_v32  ;;  %v671_v42 = vrot.slane %v667_v22, 4  ;;  %v649_v43 = vshrl.u32 %v2971_v27, 16  ;;  %v652_v44 = vshll.u32 %v2971_v27, 16  ;;  %v2976_v60 = vpack.c.bf16 %v415_v49, %v415_v49 }
 0x146   :  { %v787_v47 = vsel %vm3969_vm6, %v646_v33, %v786_v23  ;;  %v790_v48 = vsel %vm3865_vm3, %v647_v35, %v789_v24  ;;  %v805_v53 = vsel %vm3969_vm6, %v670_v41, %v804_v26  ;;  %v413_v61 = vmax.f32 %v397_v50, 0.0  ;;  %v843_v1 = vld [vmem:[#allocation2 + $0x24] sm:$0x1]  ;;  %v822_v23 = vld [vmem:[#allocation2 + $0x88] sm:$0xf] }
 0x147   :  { %788 = vst [vmem:[#allocation2 + $0x58] sm:$0xf] %v787_v47  ;;  %791 = vst [vmem:[#allocation2 + $0x5c] sm:$0x1] %v790_v48  ;;  %v808_v54 = vsel %vm3865_vm3, %v671_v42, %v807_v36  ;;  %v651_v55 = vrot.slane %v649_v43, 7  ;;  %v4689_v62 = vrot.slane %v4026_v30, 1  ;;  %v2821_v63 = vcombine.low %v4017_v59, %v4034_v46  ;;  %v3329_v42 = vpop.f32.mrf.mxu0 }
 0x148   :  { %806 = vst [vmem:[#allocation2 + $0x70] sm:$0xf] %v805_v53  ;;  %809 = vst [vmem:[#allocation2 + $0x74] sm:$0x1] %v808_v54  ;;  %v4056_v25 = vcombine.low %v4034_v46, %v839_v51  ;;  %v4059_v38 = vcombine.low %v4032_v37, %v841_v52  ;;  %v689_v8 = vshrl.u32 %v2976_v60, 16  ;;  %v692_v11 = vshll.u32 %v2976_v60, 16 }
 0x149   :  { %v654_v4 = vor.u32 %v652_v44, %v651_v55  ;;  %v655_v5 = vrot.slane %v651_v55, 4  ;;  %v2974_v12 = vpack.c.bf16 %v413_v61, %v413_v61  ;;  %1987 = vmatprep.mubr.bf16.mxu0 %v2821_v63  ;;  %v2820_v18 = vcombine.low %v1066_v34, %v4689_v62  ;;  %v825_v28 = vld [vmem:[#allocation2 + $0x8c] sm:$0x1]  ;;  %v810_v31 = vld [vmem:[#allocation2 + $0x78] sm:$0xf]  ;;  %v3514_v43 = vld [vmem:[#allocation8 + $0x1b0] sm:$0xff]  }
 0x14a   :  { %v4070_v24 = vcombine.low %v4053_v0, %v843_v1  ;;  %v2827_v26 = vcombine.low %v4032_v37, %v4053_v0  ;;  %v691_v27 = vrot.slane %v689_v8, 7  ;;  %v964_v29 = vshll.u32 %v4026_v30, 16  ;;  %v813_v32 = vld [vmem:[#allocation2 + $0x7c] sm:$0x1]  ;;  %v4079_v50 = vld [vmem:[#allocation2 + $0x28] sm:$0xf] }
 0x14b   :  { %v793_v20 = vsel %vm3969_vm6, %v654_v4, %v792_v56  ;;  %v796_v22 = vsel %vm3865_vm3, %v655_v5, %v795_v57  ;;  %v673_v10 = vshrl.u32 %v2974_v12, 16  ;;  %v676_v34 = vshll.u32 %v2974_v12, 16  ;;  %1988 = vmatmul.mubr.bf16.vlgmr.msra.gmra.mxu0 %v2820_v18  ;;  %v3515_v51 = vld [vmem:[#allocation8 + $0x1e8] sm:$0xff]   ;;  %v4088_v1 = vld [vmem:[#allocation2 + $0x50] sm:$0xf]  ;;  %v343_v18 = vpop.f32.mrf.mxu0 }
 0x14c   :  { %794 = vst [vmem:[#allocation2 + $0x60] sm:$0xf] %v793_v20  ;;  %797 = vst [vmem:[#allocation2 + $0x64] sm:$0x1] %v796_v22  ;;  %1995 = vmatprep.mubr.bf16.mxu0 %v2827_v26  ;;  %v962_v33 = vshrl.u32 %v4026_v30, 16  ;;  %v969_v35 = vshrl.u32 %v4056_v25, 16  ;;  %3187 = vmatpush3.bf16.msra.mxu0 %v3509_v39  ;;  %v694_v44 = vor.u32 %v692_v11, %v691_v27 }
 0x14d   :  { %v971_v36 = vshll.u32 %v4056_v25, 16  ;;  %v976_v41 = vshrl.u32 %v4059_v38, 16  ;;  %v695_v47 = vrot.slane %v691_v27, 4  ;;  %v675_v48 = vrot.slane %v673_v10, 7  ;;  %3188 = vmatprep.subr.bf16.mxu0 %v3513_v19  ;;  %v845_v56 = vld [vmem:[#allocation2 + $0x2c] sm:$0x1] }
 0x14e   :  { %v966_v49 = vrot.slane %v964_v29, 1  ;;  %v978_v53 = vshll.u32 %v4059_v38, 16  ;;  %v4690_v54 = vrot.slane %v4056_v25, 1  ;;  %v4687_v55 = vrot.slane %v4059_v38, 1  ;;  %v855_v4 = vld [vmem:[#allocation2 + $0x54] sm:$0x1] }
 0x14f   :  { %v973_v52 = vrot.slane %v971_v36, 1  ;;  %v823_v57 = vsel %vm3969_vm6, %v694_v44, %v822_v23  ;;  %v826_v60 = vsel %vm3865_vm3, %v695_v47, %v825_v28  ;;  %v678_v61 = vor.u32 %v676_v34, %v675_v48  ;;  %v4100_v12 = vld [vmem:[#allocation2 + $0x30] sm:$0xf]  ;;  %v3519_v19 = vld [vmem:[#allocation8 + $0x1a8] sm:$0xff]   ;;  %v847_v26 = vld [vmem:[#allocation2 + $0x34] sm:$0x1] }
 0x150   :  { %v679_v63 = vrot.slane %v675_v48, 4  ;;  %824 = vst [vmem:[#allocation2 + $0x88] sm:$0xf] %v823_v57  ;;  %827 = vst [vmem:[#allocation2 + $0x8c] sm:$0x1] %v826_v60  ;;  %v4090_v5 = vor.u32 %v966_v49, %v962_v33  ;;  %v980_v8 = vrot.slane %v978_v53, 1  ;;  %v4098_v11 = vcombine.low %v4690_v54, %v4687_v55  ;;  %3189 = vmatpush3.bf16.msra.mxu0 %v3514_v43 }
 0x151   :  { %v4092_v39 = vor.u32 %v973_v52, %v969_v35  ;;  %v811_v20 = vsel %vm3969_vm6, %v678_v61, %v810_v31  ;;  %v377_v23 = vmul.f32 %v3329_v42, %v3941_v2  ;;  %v4108_v27 = vcombine.low %v4079_v50, %v845_v56  ;;  %3190 = vmatprep.subr.bf16.mxu0 %v3515_v51  ;;  %v3485_v34 = vld [vmem:[#allocation8 + $0x138] sm:$0xff]   ;;  %v3489_v31 = vld [vmem:[#allocation8 + $0x170] sm:$0xff]   ;;  %v3523_v43 = vld [vmem:[#allocation8 + $0x1e0] sm:$0xff]  }
 0x152   :  { %v814_v22 = vsel %vm3865_vm3, %v679_v63, %v813_v32  ;;  %812 = vst [vmem:[#allocation2 + $0x78] sm:$0xf] %v811_v20  ;;  %v2819_v28 = vcombine.low %v4048_v58, %v4090_v5  ;;  %v4114_v29 = vor.u32 %v980_v8, %v976_v41  ;;  %v4117_v32 = vcombine.low %v4088_v1, %v855_v4  ;;  %v4126_v42 = vld [vmem:[#allocation2 + $0x38] sm:$0xf]  ;;  %v849_v41 = vld [vmem:[#allocation2 + $0x3c] sm:$0x1] }
 0x153   :  { %815 = vst [vmem:[#allocation2 + $0x7c] sm:$0x1] %v814_v22  ;;  %v2818_v33 = vcombine.low %v3943_v3, %v4017_v59  ;;  %1996 = vmatmul.mubr.bf16.gmra.mxu0 %v4098_v11  ;;  %v400_v35 = vadd.f32 %v3948_v7, %v377_v23  ;;  %v2833_v58 = vcombine.low %v4079_v50, %v4100_v12  ;;  %v985_v59 = vshll.u32 %v4070_v24, 16  ;;  %v3524_v48 = vld [vmem:[#allocation8 + $0x1a0] sm:$0xff]   ;;  %v3525_v53 = vld [vmem:[#allocation8 + $0x1d8] sm:$0xff]   ;;  %v3491_v56 = vld [vmem:[#allocation8 + $0x130] sm:$0xff]  }
 0x154   :  { %v375_v36 = vmul.f32 %v3941_v2, %v343_v18  ;;  %1890 = vmatprep.mubr.bf16.mxu1 %v2819_v28  ;;  %v4130_v44 = vcombine.low %v4092_v39, %v4114_v29  ;;  %v4133_v3 = vcombine.low %v4100_v12, %v847_v26  ;;  %3191 = vmatpush3.bf16.msra.mxu0 %v3519_v19  ;;  %v990_v51 = vshrl.u32 %v4108_v27, 16  ;;  %v4146_v18 = vld [vmem:[#allocation2 + $0x40] sm:$0xf]  ;;  %v3495_v19 = vld [vmem:[#allocation8 + $0x168] sm:$0xff]   ;;  %v863_v17 = vld [vmem:[#allocation2 + $0x74] sm:$0x1] }
 0x155   :  { %1891 = vmatmul.mubr.bf16.vlgmr.msra.gmra.mxu1 %v2818_v33  ;;  %v416_v2 = vmax.f32 %v400_v35, 0.0  ;;  %2003 = vmatprep.mubr.bf16.mxu0 %v2833_v58  ;;  %v992_v52 = vshll.u32 %v4108_v27, 16  ;;  %v987_v57 = vrot.slane %v985_v59, 1  ;;  %v4688_v60 = vrot.slane %v4070_v24, 1  ;;  %v4177_v55 = vld [vmem:[#allocation2 + $0x60] sm:$0xf] }
 0x156   :  { %v398_v49 = vadd.f32 %v3948_v7, %v375_v36  ;;  %3123 = vmatpush3.bf16.msra.mxu1 %v3485_v34  ;;  %1898 = vmatprep.mubr.bf16.mxu1 %v4130_v44  ;;  %v4686_v61 = vrot.slane %v4108_v27, 1  ;;  %v4144_v63 = vcombine.low %v4126_v42, %v849_v41  ;;  %v1013_v20 = vshll.u32 %v4117_v32, 16  ;;  %v3529_v34 = vld [vmem:[#allocation8 + $0x198] sm:$0xff]   ;;  %v828_v41 = vld [vmem:[#allocation2 + $0x90] sm:$0xf] }
 0x157   :  { %v2977_v4 = vpack.c.bf16 %v416_v2, %v416_v2  ;;  %3124 = vmatprep.subr.bf16.mxu1 %v3489_v31  ;;  %v994_v7 = vrot.slane %v992_v52, 1  ;;  %3192 = vmatprep.subr.bf16.mxu0 %v3523_v43  ;;  %v4151_v22 = vcombine.low %v4034_v46, %v4032_v37  ;;  %v983_v23 = vshrl.u32 %v4070_v24, 16  ;;  %v3533_v31 = vld [vmem:[#allocation8 + $0x1d0] sm:$0xff]   ;;  %v4164_v37 = vld [vmem:[#allocation2 + $0x58] sm:$0xf]  ;;  %v3497_v2 = vld [vmem:[#allocation8 + $0x128] sm:$0xff]  }
 0x158   :  { %v414_v8 = vmax.f32 %v398_v49, 0.0  ;;  %v4158_v26 = vcombine.low %v4688_v60, %v4686_v61  ;;  %v2839_v28 = vcombine.low %v4126_v42, %v4146_v18  ;;  %3193 = vmatpush3.bf16.msra.mxu0 %v3524_v48  ;;  %v857_v46 = vld [vmem:[#allocation2 + $0x5c] sm:$0x1]  ;;  %v831_v43 = vld [vmem:[#allocation2 + $0x94] sm:$0x1]  ;;  %v999_v49 = vshll.u32 %v4133_v3, 16 }
 0x159   :  { %v697_v33 = vshrl.u32 %v2977_v4, 16  ;;  %v700_v35 = vshll.u32 %v2977_v4, 16  ;;  %v4162_v36 = vor.u32 %v994_v7, %v990_v51  ;;  %3194 = vmatprep.subr.bf16.mxu0 %v3525_v53  ;;  %v4166_v59 = vor.u32 %v987_v57, %v983_v23  ;;  %v3501_v7 = vld [vmem:[#allocation8 + $0x160] sm:$0xff]  }
 0x15a   :  { %v2975_v58 = vpack.c.bf16 %v414_v8, %v414_v8  ;;  %3125 = vmatpush3.bf16.msra.mxu1 %v3491_v56  ;;  %v1004_v48 = vshrl.u32 %v4144_v63, 16  ;;  %v1006_v52 = vshll.u32 %v4144_v63, 16  ;;  %v816_v61 = vld [vmem:[#allocation2 + $0x80] sm:$0xf]  ;;  %v819_v56 = vld [vmem:[#allocation2 + $0x84] sm:$0x1] }
 0x15b   :  { %v699_v4 = vrot.slane %v697_v33, 7  ;;  %2004 = vmatmul.mubr.bf16.gmra.mxu0 %v4158_v26  ;;  %3126 = vmatprep.subr.bf16.mxu1 %v3495_v19  ;;  %v4175_v57 = vcombine.low %v4166_v59, %v4162_v36  ;;  %v1001_v23 = vrot.slane %v999_v49, 1  ;;  %v4180_v33 = vcombine.low %v4164_v37, %v857_v46  ;;  %v3534_v19 = vld [vmem:[#allocation8 + $0x190] sm:$0xff]   ;;  %v859_v53 = vld [vmem:[#allocation2 + $0x64] sm:$0x1] }
 0x15c   :  { %v681_v8 = vshrl.u32 %v2975_v58, 16  ;;  %v684_v51 = vshll.u32 %v2975_v58, 16  ;;  %2011 = vmatprep.mubr.bf16.mxu0 %v2839_v28  ;;  %v1008_v10 = vrot.slane %v1006_v52, 1  ;;  %v3503_v58 = vld [vmem:[#allocation8 + $0x120] sm:$0xff]   ;;  %3195 = vmatpush3.bf16.msra.mxu0 %v3529_v34  ;;  %v3535_v28 = vld [vmem:[#allocation8 + $0x1c8] sm:$0xff]   ;;  %v997_v49 = vshrl.u32 %v4133_v3, 16 }
 0x15d   :  { %v702_v60 = vor.u32 %v700_v35, %v699_v4  ;;  %v703_v62 = vrot.slane %v699_v4, 4  ;;  %1899 = vmatmul.mubr.bf16.gmra.mxu1 %v4151_v22  ;;  %3196 = vmatprep.subr.bf16.mxu0 %v3533_v31  ;;  %v1015_v46 = vrot.slane %v1013_v20, 1  ;;  %v4186_v52 = vld [vmem:[#allocation2 + $0x68] sm:$0xf]  ;;  %v861_v34 = vld [vmem:[#allocation2 + $0x6c] sm:$0x1]  ;;  %v4199_v15 = vcombine.low %v4177_v55, %v859_v53 }
 0x15e   :  { %v683_v54 = vrot.slane %v681_v8, 7  ;;  %1906 = vmatprep.mubr.bf16.mxu1 %v4175_v57  ;;  %3127 = vmatpush3.bf16.msra.mxu1 %v3497_v2  ;;  %v4192_v31 = vld [vmem:[#allocation2 + $0x70] sm:$0xf]  ;;  %v4194_v2 = vor.u32 %v1001_v23, %v997_v49  ;;  %v4196_v20 = vor.u32 %v1008_v10, %v1004_v48  ;;  %v1018_v10 = vshrl.u32 %v4180_v33, 16  ;;  %v3540_v48 = vld [vmem:[#allocation8 + $0x1c0] sm:$0xff]  }
 0x15f   :  { %v829_v35 = vsel %vm3969_vm6, %v702_v60, %v828_v41  ;;  %v832_v4 = vsel %vm3865_vm3, %v703_v62, %v831_v43  ;;  %3128 = vmatprep.subr.bf16.mxu1 %v3501_v7  ;;  %v1020_v60 = vshll.u32 %v4180_v33, 16  ;;  %v3536_v62 = vld [vmem:[#allocation8 + $0x188] sm:$0xff]   ;;  %v4711_v43 = vrot.slane %v4144_v63, 1  ;;  %v865_v23 = vld [vmem:[#allocation2 + $0x7c] sm:$0x1]  ;;  %v3541_v49 = vld [vmem:[#allocation8 + $0x180] sm:$0xff]  }
 0x160   :  { %v686_v8 = vor.u32 %v684_v51, %v683_v54  ;;  %v687_v47 = vrot.slane %v683_v54, 4  ;;  %830 = vst [vmem:[#allocation2 + $0x90] sm:$0xf] %v829_v35  ;;  %833 = vst [vmem:[#allocation2 + $0x94] sm:$0x1] %v832_v4  ;;  %3197 = vmatpush3.bf16.msra.mxu0 %v3534_v19  ;;  %v4712_v51 = vrot.slane %v4133_v3, 1  ;;  %v2848_v53 = vcombine.low %v4164_v37, %v4177_v55 }
 0x161   :  { %3198 = vmatprep.subr.bf16.mxu0 %v3535_v28  ;;  %v1022_v45 = vrot.slane %v1020_v60, 1  ;;  %v4216_v21 = vcombine.low %v4186_v52, %v861_v34  ;;  %v4225_v19 = vcombine.low %v4053_v0, %v4079_v50  ;;  %v3520_v28 = vld [vmem:[#allocation8 + $0x150] sm:$0xff]   ;;  %v1074_v34 = vrot.slane %v4117_v32, 1 }
 0x162   :  { %v817_v54 = vsel %vm3969_vm6, %v686_v8, %v816_v61  ;;  %v820_v41 = vsel %vm3865_vm3, %v687_v47, %v819_v56  ;;  %v4210_v7 = vcombine.low %v4712_v51, %v4711_v43  ;;  %3129 = vmatpush3.bf16.msra.mxu1 %v3503_v58  ;;  %v4219_v47 = vcombine.low %v4192_v31, %v863_v17  ;;  %v3512_v61 = vld [vmem:[#allocation8 + $0x118] sm:$0xff]   ;;  %v3522_v60 = vld [vmem:[#allocation8 + $0x110] sm:$0xff]  }
 0x163   :  { %818 = vst [vmem:[#allocation2 + $0x80] sm:$0xf] %v817_v54  ;;  %821 = vst [vmem:[#allocation2 + $0x84] sm:$0x1] %v820_v41  ;;  %v4221_v56 = vld [vmem:[#allocation2 + $0x78] sm:$0xf]  ;;  %3130 = vmatprep.subr.bf16.mxu1 %v3510_v16  ;;  %v4230_v58 = vcombine.low %v4194_v2, %v4196_v20  ;;  %v4242_v4 = vor.u32 %v1022_v45, %v1018_v10 }
 0x164   :  { %2012 = vmatmul.mubr.bf16.gmra.mxu0 %v4210_v7  ;;  %v1027_v17 = vshll.u32 %v4199_v15, 16  ;;  %v4694_v0 = vrot.slane %v4180_v33, 1  ;;  %v4237_v50 = vcombine.low %v4221_v56, %v865_v23  ;;  %v4713_v16 = vshrl.u32 %v4117_v32, 16  ;;  %v3530_v54 = vld [vmem:[#allocation8 + $0x148] sm:$0xff]  }
 0x165   :  { %2019 = vmatprep.mubr.bf16.mxu0 %v2848_v53  ;;  %3199 = vmatpush3.bf16.msra.mxu0 %v3536_v62  ;;  %v1034_v8 = vshll.u32 %v4216_v21, 16  ;;  %v1041_v62 = vshll.u32 %v4219_v47, 16  ;;  %v1025_v41 = vshrl.u32 %v4199_v15, 16  ;;  %v1032_v51 = vshrl.u32 %v4216_v21, 16 }
 0x166   :  { %1907 = vmatmul.mubr.bf16.gmra.mxu1 %v4225_v19  ;;  %3200 = vmatprep.subr.bf16.mxu0 %v3540_v48  ;;  %v1016_v35 = vor.u32 %v1015_v46, %v4713_v16  ;;  %v1029_v43 = vrot.slane %v1027_v17, 1  ;;  %v2847_v32 = vcombine.low %v1074_v34, %v4694_v0  ;;  %v2854_v46 = vcombine.low %v4186_v52, %v4192_v31  ;;  %v3537_v16 = vld [vmem:[#allocation8 + $0x140] sm:$0xff]   ;;  %v4278_v0 = vld [vmem:[#allocation8 + $0x238] sm:$0xff]  }
 0x167   :  { %1914 = vmatprep.mubr.bf16.mxu1 %v4230_v58  ;;  %3131 = vmatpush3.bf16.msra.mxu1 %v3512_v61  ;;  %v1039_v53 = vshrl.u32 %v4219_v47, 16  ;;  %v1048_v45 = vshll.u32 %v4237_v50, 16  ;;  %v1036_v23 = vrot.slane %v1034_v8, 1  ;;  %v1043_v17 = vrot.slane %v1041_v62, 1 }
 0x168   :  { %3132 = vmatprep.subr.bf16.mxu1 %v3520_v28  ;;  %v2846_v61 = vcombine.low %v1016_v35, %v4242_v4  ;;  %v4262_v34 = vcombine.low %v4100_v12, %v4126_v42  ;;  %v4268_v8 = vor.u32 %v1029_v43, %v1025_v41  ;;  %v1046_v62 = vshrl.u32 %v4237_v50, 16 }
 0x169   :  { %3201 = vmatpush3.bf16.msra.mxu0 %v3541_v49  ;;  %v3532_v49 = vld [vmem:[#allocation8 + $0x108] sm:$0xff]   ;;  %v1050_v12 = vrot.slane %v1048_v45, 1  ;;  %v4272_v42 = vor.u32 %v1036_v23, %v1032_v51  ;;  %v4714_v51 = vrot.slane %v4199_v15, 1 }
 0x16a   :  { %v4252_v10 = vld [vmem:[#allocation2 + $0x80] sm:$0xf]  ;;  %v867_v48 = vld [vmem:[#allocation2 + $0x84] sm:$0x1]  ;;  %v869_v23 = vld [vmem:[#allocation2 + $0x8c] sm:$0x1] }
 0x16b   :  { %v4258_v28 = vcombine.low %v4252_v10, %v867_v48  ;;  %3133 = vmatpush3.bf16.msra.mxu1 %v3522_v60  ;;  %v4699_v60 = vrot.slane %v4216_v21, 1  ;;  %v2828_v48 = vcombine.low %v4114_v29, %v4166_v59  ;;  %v4290_v45 = vor.u32 %v1050_v12, %v1046_v62  ;;  %v872_v59 = vld [vmem:[#allocation2 + $0x98] sm:$0xf] }
 0x16c   :  { %2020 = vmatmul.mubr.bf16.gmra.mxu0 %v2847_v32  ;;  %3134 = vmatprep.subr.bf16.mxu1 %v3530_v54  ;;  %v4274_v54 = vor.u32 %v1043_v17, %v1039_v53  ;;  %v4306_v62 = vcombine.low %v4268_v8, %v4272_v42  ;;  %v4723_v29 = vcombine.low %v4162_v36, %v4194_v2  ;;  %v4724_v36 = vrot.slane %v4199_v15, 1 }
 0x16d   :  { %2027 = vmatprep.mubr.bf16.mxu0 %v2854_v46  ;;  %v1053_v9 = vshrl.u32 %v4258_v28, 16  ;;  %v1055_v35 = vshll.u32 %v4258_v28, 16  ;;  %v3539_v46 = vld [vmem:[#allocation8 + $0x100] sm:$0xff]   ;;  %v4288_v53 = vcombine.low %v4714_v51, %v4699_v60  ;;  %v4320_v51 = vld [vmem:[#allocation2 + $0x90] sm:$0xf]  ;;  %v4715_v60 = vrot.slane %v4056_v25, 1 }
 0x16e   :  { %1915 = vmatmul.mubr.bf16.gmra.mxu1 %v4262_v34  ;;  %v3543_v25 = vld [vmem:[#allocation8 + $0x230] sm:$0xff]   ;;  %v4725_v2 = vrot.slane %v4180_v33, 1  ;;  %v4726_v15 = vrot.slane %v4219_v47, 1  ;;  %v4727_v33 = vrot.slane %v4216_v21, 1  ;;  %v4731_v21 = vcombine.low %v4272_v42, %v4274_v54 }
 0x16f   :  { %1922 = vmatprep.mubr.bf16.mxu1 %v2846_v61  ;;  %3135 = vmatpush3.bf16.msra.mxu1 %v3532_v49  ;;  %v1057_v32 = vrot.slane %v1055_v35, 1  ;;  %v868_v61 = vld [vmem:[#allocation2 + $0x88] sm:$0xf] }
 0x170   :  { %3136 = vmatprep.subr.bf16.mxu1 %v3537_v16  ;;  %v2845_v16 = vcombine.low %v4088_v1, %v4164_v37  ;;  %v4308_v12 = vcombine.low %v868_v61, %v869_v23  ;;  %v2866_v23 = vcombine.low %v868_v61, %v4320_v51 }
 0x171   :  { %v4280_v41 = vor.u32 %v1057_v32, %v1053_v9  ;;  %v2860_v9 = vcombine.low %v4221_v56, %v4252_v10  ;;  %v4700_v32 = vrot.slane %v4219_v47, 1 }
 0x172   :  { %v1062_v1 = vshll.u32 %v4308_v12, 16  ;;  %v1060_v35 = vshrl.u32 %v4308_v12, 16  ;;  %v4697_v17 = vrot.slane %v4308_v12, 1 }
 0x173   :  { %3137 = vmatpush3.bf16.msra.mxu1 %v3539_v46  ;;  %v4696_v46 = vrot.slane %v4237_v50, 1 }
 0x174   :  { %2028 = vmatmul.mubr.bf16.gmra.mxu0 %v4288_v53  ;;  %3330 = vmatprep.subr.bf16.mxu1 %v4278_v0  ;;  %v1064_v49 = vrot.slane %v1062_v1, 1 }
 0x175   :  { %2035 = vmatprep.mubr.bf16.mxu0 %v2860_v9  ;;  %v4318_v37 = vcombine.low %v4700_v32, %v4696_v46  ;;  %v4325_v9 = vcombine.low %v4177_v55, %v4186_v52  ;;  %v4698_v46 = vrot.slane %v4258_v28, 1 }
 0x176   :  { %1923 = vmatmul.mubr.bf16.gmra.mxu1 %v2845_v16  ;;  %v4330_v16 = vcombine.low %v4274_v54, %v4290_v45  ;;  %v4337_v55 = vor.u32 %v1064_v49, %v1060_v35  ;;  %v851_v49 = vld [vmem:[#allocation2 + $0x44] sm:$0x1]  ;;  %v852_v35 = vld [vmem:[#allocation2 + $0x48] sm:$0xf] }
 0x177   :  { %1930 = vmatprep.mubr.bf16.mxu1 %v4306_v62  ;;  %v4343_v52 = vcombine.low %v4698_v46, %v4697_v17  ;;  %v853_v17 = vld [vmem:[#allocation2 + $0x4c] sm:$0x1]  ;;  %v4358_v46 = vcombine.low %v4146_v18, %v851_v49 }
 0x178   :  { %v4352_v1 = vcombine.low %v4280_v41, %v4337_v55 }
 0x179   :  { %v1095_v49 = vshll.u32 %v4358_v46, 16  ;;  %v1093_v43 = vshrl.u32 %v4358_v46, 16 }
 0x17c   :  { %2036 = vmatmul.mubr.bf16.gmra.mxu0 %v4318_v37 }
 0x17d   :  { %2043 = vmatprep.mubr.bf16.mxu0 %v2866_v23  ;;  %v4347_v23 = vcombine.low %v4192_v31, %v4221_v56  ;;  %v4360_v31 = vcombine.low %v852_v35, %v853_v17  ;;  %v4363_v56 = vcombine.low %v4252_v10, %v868_v61  ;;  %v1097_v10 = vrot.slane %v1095_v49, 1 }
 0x17e   :  { %1931 = vmatmul.mubr.bf16.gmra.mxu1 %v4325_v9 }
 0x17f   :  { %1938 = vmatprep.mubr.bf16.mxu1 %v4330_v16  ;;  %v1121_v17 = vshll.u32 %v4360_v31, 16  ;;  %v1119_v61 = vshrl.u32 %v4360_v31, 16  ;;  %v1132_v42 = vrot.slane %v4360_v31, 1  ;;  %v3561_v31 = vld [vmem:[#allocation11 + $0x10] sm:$0xff]  }
 0x184   :  { %2044 = vmatmul.mubr.bf16.gmra.mxu0 %v4343_v52 }
 0x185   :  { %2181 = vmatprep.mubr.bf16.mxu0 %v4130_v44  ;;  %v4716_v44 = vrot.slane %v4026_v30, 1  ;;  %v4717_v30 = vrot.slane %v4070_v24, 1  ;;  %v4720_v24 = vrot.slane %v4133_v3, 1  ;;  %v3549_v3 = vld [vmem:[#allocation8 + $0x210] sm:$0xff]  }
 0x186   :  { %1939 = vmatmul.mubr.bf16.gmra.mxu1 %v4347_v23 }
 0x187   :  { %1946 = vmatprep.mubr.bf16.mxu1 %v4352_v1  ;;  %v2823_v32 = vcombine.low %v4716_v44, %v4715_v60  ;;  %v1098_v44 = vor.u32 %v1097_v10, %v1093_v43  ;;  %v873_v43 = vld [vmem:[#allocation2 + $0x9c] sm:$0x1]  ;;  %v2850_v10 = vcombine.low %v4725_v2, %v4724_v36 }
 0x188   :  { %v3565_v36 = vld [vmem:[#allocation9 + $0x18] sm:$0xff]  }
 0x18c   :  { %2182 = vmatmul.mubr.bf16.vlgmr.msra.gmra.mxu0 %v4151_v22  ;;  %v1123_v22 = vrot.slane %v1121_v17, 1  ;;  %v3545_v17 = vld [vmem:[#allocation8 + $0x228] sm:$0xff]  }
 0x18d   :  { %2189 = vmatprep.mubr.bf16.mxu0 %v4175_v57  ;;  %v4718_v57 = vrot.slane %v4059_v38, 1  ;;  %v3547_v38 = vld [vmem:[#allocation8 + $0x220] sm:$0xff]  }
 0x18e   :  { %1947 = vmatmul.mubr.bf16.gmra.mxu1 %v4363_v56  ;;  %v1124_v49 = vor.u32 %v1123_v22, %v1119_v61 }
 0x18f   :  { %2084 = vmatprep.mubr.bf16.mxu1 %v2823_v32  ;;  %v2829_v60 = vcombine.low %v4718_v57, %v4717_v30  ;;  %v4719_v32 = vcombine.low %v4090_v5, %v4092_v39  ;;  %v3548_v5 = vld [vmem:[#allocation8 + $0x218] sm:$0xff]   ;;  %v1106_v39 = vrot.slane %v4358_v46, 1 }
 0x191   :  { %v2844_v54 = vcombine.low %v1106_v39, %v1132_v42 }
 0x194   :  { %2190 = vmatmul.mubr.bf16.gmra.mxu0 %v4225_v19  ;;  %v2843_v19 = vcombine.low %v1098_v44, %v1124_v49 }
 0x195   :  { %2197 = vmatprep.mubr.bf16.mxu0 %v4230_v58  ;;  %v4721_v58 = vrot.slane %v4108_v27, 1  ;;  %v4722_v27 = vrot.slane %v4144_v63, 1  ;;  %v2840_v63 = vcombine.low %v4196_v20, %v1098_v44 }
 0x196   :  { %2085 = vmatmul.mubr.bf16.vlgmr.msra.gmra.mxu1 %v4719_v32 }
 0x197   :  { %3331 = vmatpush3.bf16.msra.mxu1 %v4278_v0  ;;  %2092 = vmatprep.mubr.bf16.mxu1 %v2829_v60  ;;  %v2835_v30 = vcombine.low %v4721_v58, %v4720_v24  ;;  %v2842_v0 = vcombine.low %v4146_v18, %v852_v35  ;;  %v3551_v18 = vld [vmem:[#allocation8 + $0x208] sm:$0xff]   ;;  %v2817_v35 = vcombine.low %v872_v59, %v873_v43 }
 0x198   :  { %3332 = vmatprep.subr.bf16.mxu1 %v3543_v25 }
 0x199   :  { %v1128_v22 = vshll.u32 %v2817_v35, 16  ;;  %v1126_v20 = vshrl.u32 %v2817_v35, 16 }
 0x19b   :  { %3333 = vmatpush3.bf16.msra.mxu1 %v3543_v25  ;;  %v1130_v60 = vrot.slane %v1128_v22, 1 }
 0x19c   :  { %2198 = vmatmul.mubr.bf16.gmra.mxu0 %v4262_v34  ;;  %3334 = vmatprep.subr.bf16.mxu1 %v3545_v17  ;;  %v2841_v34 = vcombine.low %v4722_v27, %v1106_v39 }
 0x19d   :  { %2205 = vmatprep.mubr.bf16.mxu0 %v2843_v19  ;;  %v1131_v44 = vor.u32 %v1130_v60, %v1126_v20 }
 0x19e   :  { %2093 = vmatmul.mubr.bf16.gmra.mxu1 %v2828_v48  ;;  %v871_v48 = vld [vmem:[#allocation2 + $0x94] sm:$0x1] }
 0x19f   :  { %2100 = vmatprep.mubr.bf16.mxu1 %v2835_v30  ;;  %3335 = vmatpush3.bf16.msra.mxu1 %v3545_v17  ;;  %v2815_v46 = vcombine.low %v4320_v51, %v871_v48  ;;  %v4729_v17 = vrot.slane %v4258_v28, 1  ;;  %v4733_v28 = vcombine.low %v4290_v45, %v4280_v41  ;;  %v1133_v41 = vrot.slane %v2817_v35, 1  ;;  %v3563_v30 = vld [vmem:[#allocation9 + $0x20] sm:$0xff]  }
 0x1a0   :  { %3336 = vmatprep.subr.bf16.mxu1 %v3547_v38 }
 0x1a1   :  { %v1102_v61 = vshll.u32 %v2815_v46, 16  ;;  %v1100_v25 = vshrl.u32 %v2815_v46, 16 }
 0x1a3   :  { %3337 = vmatpush3.bf16.msra.mxu1 %v3547_v38  ;;  %v1104_v57 = vrot.slane %v1102_v61, 1 }
 0x1a4   :  { %2206 = vmatmul.mubr.bf16.gmra.mxu0 %v2842_v0  ;;  %3338 = vmatprep.subr.bf16.mxu1 %v3548_v5 }
 0x1a5   :  { %2213 = vmatprep.mubr.bf16.mxu0 %v4306_v62  ;;  %v3553_v62 = vld [vmem:[#allocation8 + $0x200] sm:$0xff]   ;;  %v1105_v32 = vor.u32 %v1104_v57, %v1100_v25 }
 0x1a6   :  { %2101 = vmatmul.mubr.bf16.gmra.mxu1 %v4723_v29 }
 0x1a7   :  { %2108 = vmatprep.mubr.bf16.mxu1 %v2841_v34  ;;  %3339 = vmatpush3.bf16.msra.mxu1 %v3548_v5  ;;  %v2870_v49 = vcombine.low %v1105_v32, %v1131_v44 }
 0x1a8   :  { %3340 = vmatprep.subr.bf16.mxu1 %v3549_v3 }
 0x1ab   :  { %3341 = vmatpush3.bf16.msra.mxu1 %v3549_v3 }
 0x1ac   :  { %2214 = vmatmul.mubr.bf16.gmra.mxu0 %v4325_v9  ;;  %3342 = vmatprep.subr.bf16.mxu1 %v3551_v18  ;;  %v2856_v9 = vcombine.low %v4727_v33, %v4726_v15 }
 0x1ad   :  { %2221 = vmatprep.mubr.bf16.mxu0 %v4330_v16  ;;  %v4728_v16 = vcombine.low %v4242_v4, %v4268_v8  ;;  %v2869_v4 = vcombine.low %v4320_v51, %v872_v59  ;;  %v4732_v8 = vrot.slane %v4308_v12, 1  ;;  %v3559_v12 = vld [vmem:[#allocation9 + $0x38] sm:$0xff]  }
 0x1ae   :  { %2109 = vmatmul.mubr.bf16.gmra.mxu1 %v2840_v63 }
 0x1af   :  { %2116 = vmatprep.mubr.bf16.mxu1 %v2850_v10  ;;  %3343 = vmatpush3.bf16.msra.mxu1 %v3551_v18 }
 0x1b0   :  { %3344 = vmatprep.subr.bf16.mxu1 %v3553_v62 }
 0x1b3   :  { %3345 = vmatpush3.bf16.msra.mxu1 %v3553_v62  ;;  %v3564_v62 = vld [vmem:[#allocation11 + $0x8] sm:$0xff]  }
 0x1b4   :  { %2222 = vmatmul.mubr.bf16.gmra.mxu0 %v4347_v23  ;;  %v4730_v23 = vrot.slane %v4237_v50, 1  ;;  %v2867_v50 = vcombine.low %v4337_v55, %v1105_v32  ;;  %3394 = vmatprep.subr.bf16.mxu1 %v3559_v12 }
 0x1b5   :  { %2229 = vmatprep.mubr.bf16.mxu0 %v4352_v1  ;;  %v1107_v1 = vrot.slane %v2815_v46, 1 }
 0x1b6   :  { %2117 = vmatmul.mubr.bf16.gmra.mxu1 %v4728_v16  ;;  %v2862_v47 = vcombine.low %v4730_v23, %v4729_v17  ;;  %v3566_v16 = vld [vmem:[#allocation9 + $0x10] sm:$0xff]   ;;  %v3567_v17 = vld [vmem:[#allocation11] sm:$0xff]   ;;  %v3568_v23 = vld [vmem:[#allocation9 + $0x8] sm:$0xff]  }
 0x1b7   :  { %2124 = vmatprep.mubr.bf16.mxu1 %v2856_v9  ;;  %v2868_v19 = vcombine.low %v4732_v8, %v1107_v1  ;;  %v2871_v45 = vcombine.low %v1107_v1, %v1133_v41 }
 0x1bc   :  { %2230 = vmatmul.mubr.bf16.gmra.mxu0 %v4363_v56  ;;  %v3562_v56 = vld [vmem:[#allocation9 + $0x28] sm:$0xff]  }
 0x1bd   :  { %2237 = vmatprep.mubr.bf16.mxu0 %v2870_v49 }
 0x1be   :  { %2125 = vmatmul.mubr.bf16.gmra.mxu1 %v4731_v21 }
 0x1bf   :  { %2132 = vmatprep.mubr.bf16.mxu1 %v2862_v47 }
 0x1c4   :  { %2238 = vmatmul.mubr.bf16.gmra.mxu0 %v2869_v4 }
 0x1c5   :  { %3378 = vmatprep.mubr.bf16.mxu0 %v3823_v40  ;;  %v3554_v40 = vld [vmem:[#allocation11 + $0x38] sm:$0xff]  }
 0x1c6   :  { %2133 = vmatmul.mubr.bf16.gmra.mxu1 %v4733_v28  ;;  %3362 = vmatprep.subr.bf16.mxu0 %v3554_v40 }
 0x1c7   :  { %2140 = vmatprep.mubr.bf16.mxu1 %v2868_v19  ;;  %3363 = vmatpush3.bf16.msra.mxu0 %v3554_v40 }
 0x1ce   :  { %2141 = vmatmul.mubr.bf16.gmra.mxu1 %v2867_v50 }
 0x1cf   :  { %3346 = vmatprep.mubr.bf16.mxu1 %v4098_v11  ;;  %v3555_v11 = vld [vmem:[#allocation11 + $0x30] sm:$0xff]  }
 0x1d0   :  { %3364 = vmatprep.subr.bf16.mxu0 %v3555_v11 }
 0x1d1   :  { %3365 = vmatpush3.bf16.msra.mxu0 %v3555_v11 }
 0x1d6   :  { %3347 = vmatmul.mubr.bf16.vlgmr.msra.gmra.mxu1 %v4158_v26  ;;  %v3556_v26 = vld [vmem:[#allocation11 + $0x28] sm:$0xff]  }
 0x1d7   :  { %3350 = vmatprep.mubr.bf16.mxu1 %v4210_v7  ;;  %3366 = vmatprep.subr.bf16.mxu0 %v3556_v26  ;;  %v3557_v7 = vld [vmem:[#allocation11 + $0x20] sm:$0xff]  }
 0x1d8   :  { %3367 = vmatpush3.bf16.msra.mxu0 %v3556_v26  ;;  %3395 = vmatpush3.bf16.msra.mxu1 %v3559_v12 }
 0x1d9   :  { %3368 = vmatprep.subr.bf16.mxu0 %v3557_v7 }
 0x1dc   :  { %3369 = vmatpush3.bf16.msra.mxu0 %v3557_v7 }
 0x1de   :  { %3351 = vmatmul.mubr.bf16.gmra.mxu1 %v2844_v54  ;;  %v3569_v54 = vld [vmem:[#allocation9] sm:$0xff]  }
 0x1df   :  { %3354 = vmatprep.mubr.bf16.mxu1 %v4288_v53  ;;  %v3558_v53 = vld [vmem:[#allocation11 + $0x18] sm:$0xff]  }
 0x1e0   :  { %3370 = vmatprep.subr.bf16.mxu0 %v3558_v53 }
 0x1e1   :  { %3371 = vmatpush3.bf16.msra.mxu0 %v3558_v53 }
 0x1e2   :  { %3372 = vmatprep.subr.bf16.mxu0 %v3561_v31 }
 0x1e5   :  { %3373 = vmatpush3.bf16.msra.mxu0 %v3561_v31 }
 0x1e6   :  { %3355 = vmatmul.mubr.bf16.gmra.mxu1 %v4318_v37  ;;  %v3560_v37 = vld [vmem:[#allocation9 + $0x30] sm:$0xff]   ;;  %3374 = vmatprep.subr.bf16.mxu0 %v3564_v62 }
 0x1e7   :  { %3358 = vmatprep.mubr.bf16.mxu1 %v4343_v52  ;;  %3396 = vmatprep.subr.bf16.mxu1 %v3560_v37 }
 0x1e8   :  { %3397 = vmatpush3.bf16.msra.mxu1 %v3560_v37 }
 0x1e9   :  { %3398 = vmatprep.subr.bf16.mxu1 %v3562_v56  ;;  %3375 = vmatpush3.bf16.msra.mxu0 %v3564_v62  ;;  %v4737_v62 = vld [vmem:[#allocation19_spill] sm:$0xff] }
 0x1ea   :  { %3376 = vmatprep.subr.bf16.mxu0 %v3567_v17 }
 0x1ec   :  { %3399 = vmatpush3.bf16.msra.mxu1 %v3562_v56 }
 0x1ed   :  { %3400 = vmatprep.subr.bf16.mxu1 %v3563_v30  ;;  %3377 = vmatpush3.bf16.msra.mxu0 %v3567_v17 }
 0x1ee   :  { %3359 = vmatmul.mubr.bf16.gmra.mxu1 %v2871_v45 }
 0x1f0   :  { %3401 = vmatpush3.bf16.msra.mxu1 %v3563_v30  ;;  %3379 = vmatmul.mubr.bf16.vlgmr.msra.gmra.mxu0 %v3844_v13 }
 0x1f1   :  { %3402 = vmatprep.subr.bf16.mxu1 %v3565_v36  ;;  %3382 = vmatprep.mubr.bf16.mxu0 %v3846_v6  ;;  %v4734_v6 = vld [vmem:[#allocation17_spill] sm:$0xff] }
 0x1f4   :  { %3403 = vmatpush3.bf16.msra.mxu1 %v3565_v36 }
 0x1f5   :  { %3404 = vmatprep.subr.bf16.mxu1 %v3566_v16 }
 0x1f8   :  { %3405 = vmatpush3.bf16.msra.mxu1 %v3566_v16  ;;  %3383 = vmatmul.mubr.bf16.gmra.mxu0 %v3850_v14 }
 0x1f9   :  { %3406 = vmatprep.subr.bf16.mxu1 %v3568_v23  ;;  %3386 = vmatprep.mubr.bf16.mxu0 %v4734_v6 }
 0x1fc   :  { %3407 = vmatpush3.bf16.msra.mxu1 %v3568_v23 }
 0x1fd   :  { %3408 = vmatprep.subr.bf16.mxu1 %v3569_v54 }
 0x200   :  { %3409 = vmatpush3.bf16.msra.mxu1 %v3569_v54 }
 0x20b   :  { %v3074_v51 = vpop.f32.mrf.mxu0 }
 0x20d   :  { %v3075_v55 = vpop.f32.mrf.mxu0 }
 0x20e   :  { %v3076_v52 = vadd.f32 %v3075_v55, %v3074_v51 }
 0x20f   :  { %v3077_v38 = vpop.f32.mrf.mxu0 }
 0x211   :  { %v3078_v24 = vpop.f32.mrf.mxu0 }
 0x212   :  { %v3079_v58 = vadd.f32 %v3078_v24, %v3077_v38 }
 0x213   :  { %v3080_v5 = vpop.f32.mrf.mxu0 }
 0x215   :  { %v3010_v39 = vpop.f32.mrf.mxu1  ;;  %v3081_v0 = vpop.f32.mrf.mxu0 }
 0x216   :  { %v3082_v3 = vadd.f32 %v3081_v0, %v3080_v5 }
 0x217   :  { %v3011_v27 = vpop.f32.mrf.mxu1  ;;  %v3083_v34 = vpop.f32.mrf.mxu0 }
 0x218   :  { %v3012_v29 = vadd.f32 %v3011_v27, %v3010_v39 }
 0x219   :  { %v3013_v59 = vpop.f32.mrf.mxu1  ;;  %v3084_v48 = vpop.f32.mrf.mxu0 }
 0x21a   :  { %v4442_v43 = vadd.f32 %v3076_v52, %v3012_v29  ;;  %v3085_v18 = vadd.f32 %v3084_v48, %v3083_v34 }
 0x21b   :  { %v3014_v46 = vpop.f32.mrf.mxu1  ;;  %v3086_v35 = vpop.f32.mrf.mxu0 }
 0x21c   :  { %v3015_v63 = vadd.f32 %v3014_v46, %v3013_v59 }
 0x21d   :  { %v3016_v2 = vpop.f32.mrf.mxu1  ;;  %v3087_v10 = vpop.f32.mrf.mxu0 }
 0x21e   :  { %v4444_v61 = vadd.f32 %v3079_v58, %v3015_v63  ;;  %v3088_v22 = vadd.f32 %v3087_v10, %v3086_v35  ;;  %v4736_v35 = vld [vmem:[#allocation18_spill] sm:$0xff] }
 0x21f   :  { %v3017_v25 = vpop.f32.mrf.mxu1  ;;  %v3089_v57 = vpop.f32.mrf.mxu0  ;;  %3387 = vmatmul.mubr.bf16.gmra.mxu0 %v4736_v35 }
 0x220   :  { %v3018_v20 = vadd.f32 %v3017_v25, %v3016_v2  ;;  %3390 = vmatprep.mubr.bf16.mxu0 %v4737_v62 }
 0x221   :  { %v3019_v60 = vpop.f32.mrf.mxu1  ;;  %v3090_v15 = vpop.f32.mrf.mxu0 }
 0x222   :  { %v4446_v33 = vadd.f32 %v3082_v3, %v3018_v20  ;;  %v3091_v9 = vadd.f32 %v3090_v15, %v3089_v57 }
 0x223   :  { %v3020_v32 = vpop.f32.mrf.mxu1 }
 0x224   :  { %v3092_v44 = vpop.f32.mrf.mxu0  ;;  %v3021_v49 = vadd.f32 %v3020_v32, %v3019_v60 }
 0x226   :  { %v3022_v47 = vpop.f32.mrf.mxu1  ;;  %v3093_v21 = vpop.f32.mrf.mxu0  ;;  %v4448_v1 = vadd.f32 %v3085_v18, %v3021_v49 }
 0x227   :  { %v3094_v4 = vadd.f32 %v3093_v21, %v3092_v44  ;;  %v4739_v44 = vld [vmem:[#allocation20_spill] sm:$0xff] }
 0x228   :  { %v3023_v8 = vpop.f32.mrf.mxu1  ;;  %v3095_v19 = vpop.f32.mrf.mxu0  ;;  %3391 = vmatmul.mubr.bf16.gmra.mxu0 %v4739_v44 }
 0x229   :  { %v3024_v28 = vadd.f32 %v3023_v8, %v3022_v47 }
 0x22a   :  { %v3025_v50 = vpop.f32.mrf.mxu1  ;;  %v3096_v42 = vpop.f32.mrf.mxu0 }
 0x22b   :  { %v4450_v40 = vadd.f32 %v3088_v22, %v3024_v28  ;;  %v3097_v41 = vadd.f32 %v3096_v42, %v3095_v19 }
 0x22c   :  { %v3026_v45 = vpop.f32.mrf.mxu1  ;;  %v3098_v11 = vpop.f32.mrf.mxu0 }
 0x22d   :  { %v3027_v26 = vadd.f32 %v3026_v45, %v3025_v50 }
 0x22e   :  { %v3028_v7 = vpop.f32.mrf.mxu1  ;;  %v3099_v53 = vpop.f32.mrf.mxu0 }
 0x22f   :  { %v4454_v12 = vadd.f32 %v3091_v9, %v3027_v26  ;;  %v3100_v37 = vadd.f32 %v3099_v53, %v3098_v11 }
 0x230   :  { %v3029_v51 = vpop.f32.mrf.mxu1  ;;  %v3101_v55 = vpop.f32.mrf.mxu0 }
 0x231   :  { %v3030_v52 = vadd.f32 %v3029_v51, %v3028_v7 }
 0x232   :  { %v3031_v31 = vpop.f32.mrf.mxu1  ;;  %v3102_v56 = vpop.f32.mrf.mxu0 }
 0x233   :  { %v4456_v38 = vadd.f32 %v3094_v4, %v3030_v52  ;;  %v3103_v13 = vadd.f32 %v3102_v56, %v3101_v55 }
 0x234   :  { %v3032_v24 = vpop.f32.mrf.mxu1  ;;  %v3104_v58 = vpop.f32.mrf.mxu0 }
 0x235   :  { %v3033_v30 = vadd.f32 %v3032_v24, %v3031_v31 }
 0x236   :  { %v3034_v5 = vpop.f32.mrf.mxu1  ;;  %v3105_v39 = vpop.f32.mrf.mxu0 }
 0x237   :  { %v4460_v0 = vadd.f32 %v3097_v41, %v3033_v30  ;;  %v3106_v3 = vadd.f32 %v3105_v39, %v3104_v58 }
 0x238   :  { %v3035_v27 = vpop.f32.mrf.mxu1  ;;  %v3107_v34 = vpop.f32.mrf.mxu0 }
 0x239   :  { %v3036_v29 = vadd.f32 %v3035_v27, %v3034_v5 }
 0x23a   :  { %v3037_v59 = vpop.f32.mrf.mxu1  ;;  %v3108_v48 = vpop.f32.mrf.mxu0 }
 0x23b   :  { %v4462_v18 = vadd.f32 %v3100_v37, %v3036_v29  ;;  %v3109_v46 = vadd.f32 %v3108_v48, %v3107_v34 }
 0x23c   :  { %v3038_v14 = vpop.f32.mrf.mxu1  ;;  %v3110_v63 = vpop.f32.mrf.mxu0 }
 0x23d   :  { %4735 = vst [vmem:[#allocation17_spill] sm:$0xff] %v4462_v18  ;;  %v3039_v36 = vadd.f32 %v3038_v14, %v3037_v59 }
 0x23e   :  { %v3040_v2 = vpop.f32.mrf.mxu1  ;;  %v3111_v10 = vpop.f32.mrf.mxu0 }
 0x23f   :  { %v4466_v22 = vadd.f32 %v3103_v13, %v3039_v36  ;;  %v3112_v25 = vadd.f32 %v3111_v10, %v3110_v63 }
 0x240   :  { %v3041_v57 = vpop.f32.mrf.mxu1  ;;  %v3113_v20 = vpop.f32.mrf.mxu0 }
 0x241   :  { %4738 = vst [vmem:[#allocation18_spill] sm:$0xff] %v4466_v22  ;;  %v3042_v60 = vadd.f32 %v3041_v57, %v3040_v2 }
 0x242   :  { %v3043_v15 = vpop.f32.mrf.mxu1  ;;  %v3114_v9 = vpop.f32.mrf.mxu0 }
 0x243   :  { %v4468_v16 = vadd.f32 %v3106_v3, %v3042_v60  ;;  %v3115_v32 = vadd.f32 %v3114_v9, %v3113_v20 }
 0x244   :  { %v3044_v49 = vpop.f32.mrf.mxu1  ;;  %v3116_v17 = vpop.f32.mrf.mxu0 }
 0x245   :  { %v3045_v23 = vadd.f32 %v3044_v49, %v3043_v15 }
 0x246   :  { %v3046_v47 = vpop.f32.mrf.mxu1  ;;  %v3117_v21 = vpop.f32.mrf.mxu0 }
 0x247   :  { %v4471_v4 = vadd.f32 %v3109_v46, %v3045_v23  ;;  %v3118_v8 = vadd.f32 %v3117_v21, %v3116_v17 }
 0x248   :  { %v3047_v19 = vpop.f32.mrf.mxu1  ;;  %v4473_v28 = vpop.f32.mrf.mxu0 }
 0x249   :  { %4740 = vst [vmem:[#allocation19_spill] sm:$0xff] %v4471_v4  ;;  %v3048_v50 = vadd.f32 %v3047_v19, %v3046_v47 }
 0x24a   :  { %v3049_v42 = vpop.f32.mrf.mxu1  ;;  %v4475_v54 = vpop.f32.mrf.mxu0 }
 0x24b   :  { %v4477_v41 = vadd.f32 %v3112_v25, %v3048_v50 }
 0x24c   :  { %v3050_v45 = vpop.f32.mrf.mxu1  ;;  %v4479_v11 = vpop.f32.mrf.mxu0 }
 0x24d   :  { %4741 = vst [vmem:[#allocation20_spill] sm:$0xff] %v4477_v41  ;;  %v3051_v26 = vadd.f32 %v3050_v45, %v3049_v42 }
 0x24e   :  { %v3052_v7 = vpop.f32.mrf.mxu1  ;;  %v4481_v53 = vpop.f32.mrf.mxu0 }
 0x24f   :  { %v4483_v37 = vadd.f32 %v3115_v32, %v3051_v26 }
 0x250   :  { %v3053_v51 = vpop.f32.mrf.mxu1  ;;  %v4485_v55 = vpop.f32.mrf.mxu0 }
 0x251   :  { %4742 = vst [vmem:[#allocation21_spill] sm:$0xff] %v4483_v37  ;;  %v3054_v52 = vadd.f32 %v3053_v51, %v3052_v7 }
 0x252   :  { %v3055_v31 = vpop.f32.mrf.mxu1  ;;  %v4487_v56 = vpop.f32.mrf.mxu0 }
 0x253   :  { %v4489_v13 = vadd.f32 %v3118_v8, %v3054_v52 }
 0x254   :  { %v3056_v24 = vpop.f32.mrf.mxu1  ;;  %v3208_v58 = vpop.f32.mrf.mxu0 }
 0x255   :  { %4743 = vst [vmem:[#allocation22_spill] sm:$0xff] %v4489_v13  ;;  %v4491_v6 = vadd.f32 %v3056_v24, %v3055_v31 }
 0x256   :  { %v3138_v30 = vpop.f32.mrf.mxu1  ;;  %v3209_v5 = vpop.f32.mrf.mxu0 }
 0x258   :  { %v3139_v39 = vpop.f32.mrf.mxu1  ;;  %v4493_v3 = vpop.f32.mrf.mxu0 }
 0x259   :  { %v3140_v27 = vadd.f32 %v3139_v39, %v3138_v30 }
 0x25a   :  { %v3141_v34 = vpop.f32.mrf.mxu1  ;;  %v3212_v29 = vpop.f32.mrf.mxu0 }
 0x25b   :  { %v4496_v59 = vadd.f32 %v3140_v27, %v4442_v43 }
 0x25c   :  { %v3142_v48 = vpop.f32.mrf.mxu1  ;;  %v4498_v46 = vpop.f32.mrf.mxu0 }
 0x25e   :  { %v3144_v35 = vpop.f32.mrf.mxu1  ;;  %v4500_v14 = vpop.f32.mrf.mxu0 }
 0x260   :  { %v3145_v63 = vpop.f32.mrf.mxu1  ;;  %v4502_v62 = vpop.f32.mrf.mxu0 }
 0x261   :  { %v3146_v22 = vadd.f32 %v3145_v63, %v3144_v35  ;;  %v3204_v35 = vadd.f32 %v4481_v53, %v4479_v11  ;;  %v3207_v53 = vadd.f32 %v4487_v56, %v4485_v55 }
 0x262   :  { %v3147_v36 = vpop.f32.mrf.mxu1  ;;  %v4504_v2 = vpop.f32.mrf.mxu0 }
 0x263   :  { %v2184_v11 = vadd.f32 %v3204_v35, %v4496_v59 }
 0x264   :  { %v3148_v10 = vpop.f32.mrf.mxu1  ;;  %v4506_v25 = vpop.f32.mrf.mxu0 }
 0x266   :  { %v3150_v57 = vpop.f32.mrf.mxu1  ;;  %v4508_v20 = vpop.f32.mrf.mxu0 }
 0x268   :  { %v3151_v43 = vpop.f32.mrf.mxu1  ;;  %v4510_v60 = vpop.f32.mrf.mxu0 }
 0x26a   :  { %v3153_v15 = vpop.f32.mrf.mxu1  ;;  %v4512_v9 = vpop.f32.mrf.mxu0 }
 0x26c   :  { %v3154_v32 = vpop.f32.mrf.mxu1  ;;  %v4514_v49 = vpop.f32.mrf.mxu0 }
 0x26e   :  { %v3156_v44 = vpop.f32.mrf.mxu1  ;;  %v4516_v47 = vpop.f32.mrf.mxu0 }
 0x270   :  { %v3157_v17 = vpop.f32.mrf.mxu1  ;;  %v4520_v19 = vpop.f32.mrf.mxu0 }
 0x271   :  { %4744 = vst [vmem:[#allocation23_spill] sm:$0xff] %v4520_v19 }
 0x272   :  { %v3159_v23 = vpop.f32.mrf.mxu1  ;;  %v4526_v45 = vpop.f32.mrf.mxu0 }
 0x273   :  { %4745 = vst [vmem:[#allocation24_spill] sm:$0xff] %v4526_v45  ;;  %v2095_v45 = vadd.f32 %v3146_v22, %v4446_v33  ;;  %v4569_v33 = vld [vmem:[%s4681_s7] ss:$0 sm:$0xff] }
 0x274   :  { %v3160_v21 = vpop.f32.mrf.mxu1  ;;  %v4530_v51 = vpop.f32.mrf.mxu0 }
 0x275   :  { %4746 = vst [vmem:[#allocation25_spill] sm:$0xff] %v4530_v51 }
 0x276   :  { %v4518_v8 = vpop.f32.mrf.mxu1  ;;  %v4534_v24 = vpop.f32.mrf.mxu0 }
 0x277   :  { %4747 = vst [vmem:[#allocation26_spill] sm:$0xff] %v4534_v24 }
 0x278   :  { %v4522_v50 = vpop.f32.mrf.mxu1  ;;  %v4540_v27 = vpop.f32.mrf.mxu0  ;;  %v4758_v35 = vld [vmem:[#allocation23_spill] sm:$0xff] }
 0x279   :  { %4750 = vst [vmem:[#allocation29_spill] sm:$0xff] %v4540_v27  ;;  %v3143_v27 = vadd.f32 %v3142_v48, %v3141_v34 }
 0x27a   :  { %v4524_v42 = vpop.f32.mrf.mxu1  ;;  %v4546_v13 = vpop.f32.mrf.mxu0 }
 0x27b   :  { %4753 = vst [vmem:[#allocation32_spill] sm:$0xff] %v4546_v13  ;;  %v3152_v13 = vadd.f32 %v3151_v43, %v3150_v57  ;;  %v2090_v22 = vadd.f32 %v3143_v27, %v4444_v61 }
 0x27c   :  { %v4528_v26 = vpop.f32.mrf.mxu1  ;;  %v4552_v51 = vpop.f32.mrf.mxu0 }
 0x27d   :  { %4755 = vst [vmem:[#allocation34_spill] sm:$0xff] %v4552_v51  ;;  %v2103_v59 = vadd.f32 %v3152_v13, %v4450_v40  ;;  %v2187_v43 = vadd.f32 %v3207_v53, %v2090_v22  ;;  %v3225_v13 = vadd.f32 %v4512_v9, %v4510_v60 }
 0x27e   :  { %v3168_v7 = vpop.f32.mrf.mxu1 }
 0x280   :  { %v3169_v52 = vpop.f32.mrf.mxu1 }
 0x282   :  { %v4532_v31 = vpop.f32.mrf.mxu1 }
 0x284   :  { %v4536_v30 = vpop.f32.mrf.mxu1 }
 0x285   :  { %4748 = vst [vmem:[#allocation27_spill] sm:$0xff] %v4536_v30  ;;  %v4559_v30 = vpop.f32.mrf.mxu0 }
 0x286   :  { %v4538_v39 = vpop.f32.mrf.mxu1 }
 0x287   :  { %4749 = vst [vmem:[#allocation28_spill] sm:$0xff] %v4538_v39  ;;  %v3149_v39 = vadd.f32 %v3148_v10, %v3147_v36 }
 0x288   :  { %v4542_v37 = vpop.f32.mrf.mxu1 }
 0x289   :  { %4751 = vst [vmem:[#allocation30_spill] sm:$0xff] %v4542_v37  ;;  %v3210_v37 = vadd.f32 %v3209_v5, %v3208_v58  ;;  %v2098_v63 = vadd.f32 %v3149_v39, %v4448_v1  ;;  %v3213_v58 = vadd.f32 %v3212_v29, %v4493_v3  ;;  %v4573_v5 = vpop.f32.mrf.mxu0  ;;  %v3121_v1 = vadd.f32 %v4475_v54, %v4473_v28  ;;  %v4591_v54 = vld [vmem:[%s4682_s8] ss:$0 sm:$0xff]  ;;  %s3708_s8 = smov [#allocation12]  }
 0x28a   :  { %v4544_v41 = vpop.f32.mrf.mxu1  ;;  %v3216_v29 = vadd.f32 %v4500_v14, %v4498_v46  ;;  %v3161_v28 = vadd.f32 %v3160_v21, %v3159_v23  ;;  %v3219_v46 = vadd.f32 %v4504_v2, %v4502_v62  ;;  %v3170_v14 = vadd.f32 %v3169_v52, %v3168_v7  ;;  %s2756_s29 = sshll.u32 %s3708_s8, 4  ;;  %s2757_s29 = int_to_ptr.vmem [resolvable:$true] %s2756_s29 }
 0x28b   :  { %4752 = vst [vmem:[#allocation31_spill] sm:$0xff] %v4544_v41  ;;  %v2192_v51 = vadd.f32 %v3210_v37, %v2095_v45  ;;  %v3155_v37 = vadd.f32 %v3154_v32, %v3153_v15  ;;  %v2195_v57 = vadd.f32 %v3213_v58, %v2098_v63  ;;  %v4583_v3 = vadd.f32 %v3121_v1, %v4491_v6  ;;  %v4759_v63 = vld [vmem:[#allocation24_spill] sm:$0xff]  ;;  %v4760_v58 = vld [vmem:[#allocation25_spill] sm:$0xff]  ;;  %s3670_s30 = scalar_lea.vmem %s2757_s29, 2048  ;;  %p3675_p12 = scmp.lt.s32.totalorder %s2757_s29, %s2757_s29 }
 0x28c   :  { %v4548_v4 = vpop.f32.mrf.mxu1  ;;  %v3228_v23 = vadd.f32 %v4516_v47, %v4514_v49  ;;  %v3164_v62 = vadd.f32 %v4522_v50, %v4518_v8  ;;  %v2200_v2 = vadd.f32 %v3216_v29, %v2103_v59  ;;  %v4757_v49 = vld [vmem:[#allocation27_spill] sm:$0xff]  ;;  %v3231_v22 = vadd.f32 %v4759_v63, %v4758_v35  ;;  %v4762_v1 = vld [vmem:[#allocation17_spill] sm:$0xff]  ;;  %p3671_p11 = scmp.ne.s32.totalorder %s2757_s29, %s3670_s30  ;;  %p3676_p13 = scmp.lt.s32.totalorder %s3670_s30, %s3670_s30 }
 0x28d   :  { %4754 = vst [vmem:[#allocation33_spill] sm:$0xff] %v4548_v4  ;;  %v3158_v4 = vadd.f32 %v3157_v17, %v3156_v44  ;;  %v2106_v40 = vadd.f32 %v3155_v37, %v4454_v12  ;;  %v2114_v17 = vadd.f32 %v3161_v28, %v4460_v0  ;;  %v2127_v0 = vadd.f32 %v3170_v14, %v4468_v16 }
 0x28e   :  { %v4550_v18 = vpop.f32.mrf.mxu1  ;;  %v3173_v47 = vadd.f32 %v4757_v49, %v4532_v31  ;;  %v2119_v53 = vadd.f32 %v3164_v62, %v4762_v1  ;;  %v4770_v62 = vld [vmem:[#allocation34_spill] sm:$0xff]  ;;  %p3677_p0 = por %p3676_p13, %p3675_p12 }
 0x28f   :  { %v2111_v36 = vadd.f32 %v3158_v4, %v4456_v38  ;;  %v3222_v38 = vadd.f32 %v4508_v20, %v4506_v25  ;;  %v4595_v4 = vpop.f32.mrf.mxu0  ;;  %v2203_v8 = vadd.f32 %v3219_v46, %v2106_v40  ;;  %v4766_v40 = vld [vmem:[#allocation29_spill] sm:$0xff] }
 0x290   :  { %v4554_v24 = vpop.f32.mrf.mxu1  ;;  %p3678_p1 = pnand %p3677_p0, %p3671_p11 }
 0x291   :  { %4756 = vst [vmem:[#allocation35_spill] sm:$0xff] %v4554_v24  ;;  %v2208_v44 = vadd.f32 %v3222_v38, %v2111_v36  ;;  %v3244_v21 = vpop.f32.mrf.mxu0 }
 0x292   :  { %v4557_v19 = vpop.f32.mrf.mxu1 }
 0x293   :  { %v3245_v31 = vpop.f32.mrf.mxu0 }
 0x294   :  { %v4561_v41 = vpop.f32.mrf.mxu1  ;;  %v4774_v63 = vld [vmem:[#allocation33_spill] sm:$0xff] }
 0x296   :  { %v3348_v24 = vpop.f32.mrf.mxu1 }
 0x297   :  { %v2289_v34 = vadd.f32 %v3348_v24, %v2192_v51  ;;  %v3167_v51 = vadd.f32 %v4528_v26, %v4524_v42  ;;  %v2211_v26 = vadd.f32 %v3225_v13, %v2114_v17  ;;  %v4767_v13 = vld [vmem:[#allocation32_spill] sm:$0xff] }
 0x298   :  { %v2280_v48 = vpop.f32.mrf.mxu1  ;;  %v3237_v14 = vadd.f32 %v4767_v13, %v4766_v40 }
 0x299   :  { %v2352_v10 = vmul.f32 %v4569_v33, %v2289_v34  ;;  %v2281_v61 = vadd.f32 %v2280_v48, %v2184_v11  ;;  %v4761_v34 = vld [vmem:[#allocation26_spill] sm:$0xff] }
 0x29a   :  { %v3349_v55 = vpop.f32.mrf.mxu1  ;;  %v3234_v11 = vadd.f32 %v4761_v34, %v4760_v58  ;;  %v3246_v34 = vadd.f32 %v3245_v31, %v3244_v21  ;;  %v4775_v31 = vld [vmem:[#allocation21_spill] sm:$0xff] }
 0x29b   :  { %v2350_v56 = vmul.f32 %v4569_v33, %v2281_v61  ;;  %v2292_v6 = vadd.f32 %v3349_v55, %v2195_v57  ;;  %v2375_v32 = vadd.f32 %v4591_v54, %v2352_v10  ;;  %v4763_v10 = vld [vmem:[#allocation18_spill] sm:$0xff]  ;;  %v4764_v55 = vld [vmem:[#allocation19_spill] sm:$0xff] }
 0x29c   :  { %v2283_v15 = vpop.f32.mrf.mxu1  ;;  %v2122_v61 = vadd.f32 %v3167_v51, %v4763_v10  ;;  %v2224_v28 = vadd.f32 %v3234_v11, %v2127_v0  ;;  %v2130_v38 = vadd.f32 %v3173_v47, %v4764_v55  ;;  %v4771_v47 = vld [vmem:[#allocation22_spill] sm:$0xff] }
 0x29d   :  { %v2353_v25 = vmul.f32 %v4569_v33, %v2292_v6  ;;  %v2284_v20 = vadd.f32 %v2283_v15, %v2187_v43  ;;  %v2373_v60 = vadd.f32 %v4591_v54, %v2350_v56  ;;  %v2391_v50 = vmax.f32 %v2375_v32, 0.0  ;;  %v4765_v56 = vld [vmem:[#allocation35_spill] sm:$0xff]  ;;  %v4768_v15 = vld [vmem:[#allocation28_spill] sm:$0xff]  ;;  %v4769_v32 = vld [vmem:[#allocation30_spill] sm:$0xff] }
 0x29e   :  { %v3352_v12 = vpop.f32.mrf.mxu1  ;;  %v3182_v6 = vadd.f32 %v4765_v56, %v4550_v18  ;;  %v2219_v49 = vadd.f32 %v3231_v22, %v2122_v61  ;;  %v3243_v56 = vadd.f32 %v4595_v4, %v4573_v5 }
 0x29f   :  { %v2376_v9 = vadd.f32 %v4591_v54, %v2353_v25  ;;  %v2351_v45 = vmul.f32 %v4569_v33, %v2284_v20  ;;  %v2305_v7 = vadd.f32 %v3352_v12, %v2208_v44  ;;  %v2389_v37 = vmax.f32 %v2373_v60, 0.0 }
 0x2a0   :  { %v2296_v52 = vpop.f32.mrf.mxu1  ;;  %v3176_v25 = vadd.f32 %v4769_v32, %v4768_v15  ;;  %v3240_v12 = vadd.f32 %v4559_v30, %v4770_v62 }
 0x2a1   :  { %v2392_v24 = vmax.f32 %v2376_v9, 0.0  ;;  %v2374_v39 = vadd.f32 %v4591_v54, %v2351_v45  ;;  %v2297_v27 = vadd.f32 %v2296_v52, %v2200_v2  ;;  %v2356_v42 = vmul.f32 %v4569_v33, %v2305_v7  ;;  %v3247_v2 = vpop.f32.mrf.mxu0 }
 0x2a2   :  { %v3353_v16 = vpop.f32.mrf.mxu1  ;;  %v2216_v9 = vadd.f32 %v3228_v23, %v2119_v53  ;;  %v3185_v45 = vadd.f32 %v4561_v41, %v4557_v19  ;;  %v2143_v52 = vadd.f32 %v3182_v6, %v4771_v47  ;;  %v4773_v19 = vld [vmem:[#allocation31_spill] sm:$0xff] }
 0x2a3   :  { %v2406_v48 = vpack.c.bf16 %v2392_v24, %v2391_v50  ;;  %v2390_v36 = vmax.f32 %v2374_v39, 0.0  ;;  %v2354_v57 = vmul.f32 %v4569_v33, %v2297_v27  ;;  %v2308_v29 = vadd.f32 %v3353_v16, %v2211_v26  ;;  %v4772_v24 = vld [vmem:[#allocation20_spill] sm:$0xff]  ;;  %v3248_v11 = vpop.f32.mrf.mxu0 }
 0x2a4   :  { %v2299_v59 = vpop.f32.mrf.mxu1  ;;  %v2379_v20 = vadd.f32 %v4591_v54, %v2356_v42  ;;  %v2227_v50 = vadd.f32 %v3237_v14, %v2130_v38  ;;  %v2135_v39 = vadd.f32 %v3176_v25, %v4772_v24  ;;  %v3179_v58 = vadd.f32 %v4774_v63, %v4773_v19 }
 0x2a5   :  { %v2300_v43 = vadd.f32 %v2299_v59, %v2203_v8  ;;  %v2405_v46 = vpack.c.bf16 %v2390_v36, %v2389_v37  ;;  %v2357_v44 = vmul.f32 %v4569_v33, %v2308_v29  ;;  %v2377_v7 = vadd.f32 %v4591_v54, %v2354_v57 }
 0x2a6   :  { %v3356_v17 = vpop.f32.mrf.mxu1  ;;  %v2395_v27 = vmax.f32 %v2379_v20, 0.0  ;;  %v2146_v26 = vadd.f32 %v3185_v45, %v4583_v3  ;;  %v2240_v10 = vadd.f32 %v3246_v34, %v2143_v52  ;;  %v3249_v61 = vadd.f32 %v3248_v11, %v3247_v2 }
 0x2a7   :  { %v2355_v60 = vmul.f32 %v4569_v33, %v2300_v43  ;;  %v2321_v18 = vadd.f32 %v3356_v17, %v2224_v28  ;;  %3410 = vmatprep.mubr.bf16.mxu1 %v2405_v46  ;;  %v2380_v51 = vadd.f32 %v4591_v54, %v2357_v44  ;;  %v2393_v16 = vmax.f32 %v2377_v7, 0.0 }
 0x2a8   :  { %v2312_v0 = vpop.f32.mrf.mxu1  ;;  %3411 = vmatmul.mubr.bf16.vlgmr.msra.gmra.mxu1 %v2406_v48  ;;  %v2232_v21 = vadd.f32 %v3240_v12, %v2135_v39  ;;  %v2138_v28 = vadd.f32 %v3179_v58, %v4775_v31  ;;  %v2243_v46 = vadd.f32 %v3249_v61, %v2146_v26 }
 0x2a9   :  { %v2378_v30 = vadd.f32 %v4591_v54, %v2355_v60  ;;  %v2313_v8 = vadd.f32 %v2312_v0, %v2216_v9  ;;  %v2396_v23 = vmax.f32 %v2380_v51, 0.0  ;;  %v2360_v35 = vmul.f32 %v4569_v33, %v2321_v18 }
 0x2aa   :  { %v3357_v41 = vpop.f32.mrf.mxu1  ;;  %v2235_v62 = vadd.f32 %v3243_v56, %v2138_v28 }
 0x2ab   :  { %v2394_v42 = vmax.f32 %v2378_v30, 0.0  ;;  %v2324_v22 = vadd.f32 %v3357_v41, %v2227_v50  ;;  %v2358_v1 = vmul.f32 %v4569_v33, %v2313_v8  ;;  %v2408_v37 = vpack.c.bf16 %v2396_v23, %v2395_v27 }
 0x2ac   :  { %v2315_v53 = vpop.f32.mrf.mxu1  ;;  %v2383_v57 = vadd.f32 %v4591_v54, %v2360_v35 }
 0x2ad   :  { %v2361_v48 = vmul.f32 %v4569_v33, %v2324_v22  ;;  %v2316_v36 = vadd.f32 %v2315_v53, %v2219_v49  ;;  %v2407_v59 = vpack.c.bf16 %v2394_v42, %v2393_v16  ;;  %v2381_v6 = vadd.f32 %v4591_v54, %v2358_v1 }
 0x2ae   :  { %v3360_v29 = vpop.f32.mrf.mxu1  ;;  %v2399_v32 = vmax.f32 %v2383_v57, 0.0 }
 0x2af   :  { %v2384_v55 = vadd.f32 %v4591_v54, %v2361_v48  ;;  %v2359_v3 = vmul.f32 %v4569_v33, %v2316_v36  ;;  %v2337_v38 = vadd.f32 %v3360_v29, %v2240_v10  ;;  %3414 = vmatprep.mubr.bf16.mxu1 %v2407_v59  ;;  %v2397_v5 = vmax.f32 %v2381_v6, 0.0 }
 0x2b0   :  { %v2328_v43 = vpop.f32.mrf.mxu1  ;;  %3415 = vmatmul.mubr.bf16.gmra.mxu1 %v2408_v37  ;;  %v3380_v24 = vpop.f32.mrf.mxu0 }
 0x2b1   :  { %v2400_v40 = vmax.f32 %v2384_v55, 0.0  ;;  %v2382_v13 = vadd.f32 %v4591_v54, %v2359_v3  ;;  %v2364_v14 = vmul.f32 %v4569_v33, %v2337_v38  ;;  %v2329_v15 = vadd.f32 %v2328_v43, %v2232_v21 }
 0x2b2   :  { %v3361_v25 = vpop.f32.mrf.mxu1  ;;  %v2527_v39 = vpop.f32.mrf.mxu0 }
 0x2b3   :  { %v2398_v20 = vmax.f32 %v2382_v13, 0.0  ;;  %v2362_v44 = vmul.f32 %v4569_v33, %v2329_v15  ;;  %v2340_v17 = vadd.f32 %v3361_v25, %v2243_v46  ;;  %v2410_v12 = vpack.c.bf16 %v2400_v40, %v2399_v32 }
 0x2b4   :  { %v2331_v4 = vpop.f32.mrf.mxu1  ;;  %v2387_v2 = vadd.f32 %v4591_v54, %v2364_v14  ;;  %v3381_v27 = vpop.f32.mrf.mxu0 }
 0x2b5   :  { %v2365_v60 = vmul.f32 %v4569_v33, %v2340_v17  ;;  %v2332_v18 = vadd.f32 %v2331_v4, %v2235_v62  ;;  %v2409_v9 = vpack.c.bf16 %v2398_v20, %v2397_v5  ;;  %v2385_v45 = vadd.f32 %v4591_v54, %v2362_v44 }
 0x2b6   :  { %v2403_v0 = vmax.f32 %v2387_v2, 0.0  ;;  %v2530_v23 = vpop.f32.mrf.mxu0 }
 0x2b7   :  { %v2388_v7 = vadd.f32 %v4591_v54, %v2365_v60  ;;  %v2363_v51 = vmul.f32 %v4569_v33, %v2332_v18  ;;  %3418 = vmatprep.mubr.bf16.mxu1 %v2409_v9  ;;  %v2401_v52 = vmax.f32 %v2385_v45, 0.0 }
 0x2b8   :  { %3419 = vmatmul.mubr.bf16.gmra.mxu1 %v2410_v12  ;;  %v3384_v35 = vpop.f32.mrf.mxu0 }
 0x2b9   :  { %v2404_v49 = vmax.f32 %v2388_v7, 0.0  ;;  %v2386_v47 = vadd.f32 %v4591_v54, %v2363_v51 }
 0x2ba   :  { %v2543_v41 = vpop.f32.mrf.mxu0 }
 0x2bb   :  { %v2402_v30 = vmax.f32 %v2386_v47, 0.0  ;;  %v2412_v8 = vpack.c.bf16 %v2404_v49, %v2403_v0 }
 0x2bc   :  { %v3385_v19 = vpop.f32.mrf.mxu0 }
 0x2bd   :  { %v2411_v50 = vpack.c.bf16 %v2402_v30, %v2401_v52 }
 0x2be   :  { %v2546_v33 = vpop.f32.mrf.mxu0 }
 0x2bf   :  { %3422 = vmatprep.mubr.bf16.mxu1 %v2411_v50 }
 0x2c0   :  { %3423 = vmatmul.mubr.bf16.gmra.mxu1 %v2412_v8 }
 0x2df   :  { %v3388_v11 = vpop.f32.mrf.mxu0 }
 0x2e1   :  { %v2559_v1 = vpop.f32.mrf.mxu0 }
 0x2e3   :  { %v3389_v36 = vpop.f32.mrf.mxu0 }
 0x2e5   :  { %v2562_v59 = vpop.f32.mrf.mxu0 }
 0x2e8   :  { %v3392_v55 = vpop.f32.mrf.mxu0 }
 0x2ea   :  { %v2575_v43 = vpop.f32.mrf.mxu0 }
 0x2ec   :  { %v3393_v15 = vpop.f32.mrf.mxu0 }
 0x2ee   :  { %v2578_v17 = vpop.f32.mrf.mxu0 }
 0x368   :  { %v3412_v63 = vpop.f32.mrf.mxu1 }
 0x369   :  { %v2681_v58 = vadd.f32 %v3412_v63, %v3380_v24 }
 0x36a   :  { %v2672_v34 = vpop.f32.mrf.mxu1 }
 0x36b   :  { %2737 = vst [vmem:[#allocation12 + $0x10] sm:$0xff] %v2681_v58  ;;  %v2673_v54 = vadd.f32 %v2672_v34, %v2527_v39 }
 0x36c   :  { %v3413_v42 = vpop.f32.mrf.mxu1 }
 0x36d   :  { %2735 = vst [vmem:[#allocation12] sm:$0xff] %v2673_v54  ;;  %v2684_v22 = vadd.f32 %v3413_v42, %v3381_v27 }
 0x36e   :  { %v2675_v26 = vpop.f32.mrf.mxu1 }
 0x36f   :  { %2738 = vst [vmem:[#allocation12 + $0x18] sm:$0xff] %v2684_v22  ;;  %v2676_v16 = vadd.f32 %v2675_v26, %v2530_v23 }
 0x370   :  { %v3416_v53 = vpop.f32.mrf.mxu1 }
 0x371   :  { %2736 = vst [vmem:[#allocation12 + $0x8] sm:$0xff] %v2676_v16  ;;  %v2697_v37 = vadd.f32 %v3416_v53, %v3384_v35 }
 0x372   :  { %v2688_v48 = vpop.f32.mrf.mxu1 }
 0x373   :  { %2741 = vst [vmem:[#allocation12 + $0x30] sm:$0xff] %v2697_v37  ;;  %v2689_v10 = vadd.f32 %v2688_v48, %v2543_v41 }
 0x374   :  { %v3417_v61 = vpop.f32.mrf.mxu1 }
 0x375   :  { %2739 = vst [vmem:[#allocation12 + $0x20] sm:$0xff] %v2689_v10  ;;  %v2700_v57 = vadd.f32 %v3417_v61, %v3385_v19 }
 0x376   :  { %v2691_v29 = vpop.f32.mrf.mxu1 }
 0x377   :  { %2742 = vst [vmem:[#allocation12 + $0x38] sm:$0xff] %v2700_v57  ;;  %v2692_v21 = vadd.f32 %v2691_v29, %v2546_v33 }
 0x378   :  { %v3420_v31 = vpop.f32.mrf.mxu1 }
 0x379   :  { %2740 = vst [vmem:[#allocation12 + $0x28] sm:$0xff] %v2692_v21  ;;  %v2713_v28 = vadd.f32 %v3420_v31, %v3388_v11 }
 0x37a   :  { %v2704_v3 = vpop.f32.mrf.mxu1 }
 0x37b   :  { %2745 = vst [vmem:[#allocation12 + $0x50] sm:$0xff] %v2713_v28  ;;  %v2705_v38 = vadd.f32 %v2704_v3, %v2559_v1 }
 0x37c   :  { %v3421_v56 = vpop.f32.mrf.mxu1 }
 0x37d   :  { %2743 = vst [vmem:[#allocation12 + $0x40] sm:$0xff] %v2705_v38  ;;  %v2716_v6 = vadd.f32 %v3421_v56, %v3389_v36 }
 0x37e   :  { %v2707_v46 = vpop.f32.mrf.mxu1 }
 0x37f   :  { %2746 = vst [vmem:[#allocation12 + $0x58] sm:$0xff] %v2716_v6  ;;  %v2708_v40 = vadd.f32 %v2707_v46, %v2562_v59 }
 0x380   :  { %v3424_v13 = vpop.f32.mrf.mxu1 }
 0x381   :  { %2744 = vst [vmem:[#allocation12 + $0x48] sm:$0xff] %v2708_v40  ;;  %v2729_v14 = vadd.f32 %v3424_v13, %v3392_v55 }
 0x382   :  { %v2720_v32 = vpop.f32.mrf.mxu1 }
 0x383   :  { %2749 = vst [vmem:[#allocation12 + $0x70] sm:$0xff] %v2729_v14  ;;  %v2721_v25 = vadd.f32 %v2720_v32, %v2575_v43 }
 0x384   :  { %v3425_v20 = vpop.f32.mrf.mxu1 }
 0x385   :  { %2747 = vst [vmem:[#allocation12 + $0x60] sm:$0xff] %v2721_v25  ;;  %v2732_v44 = vadd.f32 %v3425_v20, %v3393_v15 }
 0x386   :  { %v2723_v62 = vpop.f32.mrf.mxu1 }
 0x387   :  { %2750 = vst [vmem:[#allocation12 + $0x78] sm:$0xff] %v2732_v44  ;;  %v2724_v5 = vadd.f32 %v2723_v62, %v2578_v17 }
 0x389   :  { %2748 = vst [vmem:[#allocation12 + $0x68] sm:$0xff] %v2724_v5 }
 0x38a   :  { %3681 = shalt.err (!%p3678_p1)
}
 0x38b   :  { %2762 = dma.vmem_to_hbm [thread:$0]  %s2757_s29, 2048, %s4685_s11, [#allocation5], %s3703_s12, %s3703_s12, %s3704_s13  }
 0x38c   :  { %3696 = dma.done.wait [#allocation5], 2048  }
 0x38d   :  { %3697 = vsyncadd [#allocation5], 4294965248 }
 0x38e   :  { %2766 = vsyncpa [#allocation4], 1 }
 0x38f   :  { %2767 = vsyncpa [#allocation7], 1 }
 0x390   :  { %2768 = vsyncpa [#allocation10], 1 }
 0x391   :  { %2769 = vsyncpa [#allocation5], 1 }

</bundles_post_ra>
